<compile_context>
chip_gen: v7x
topology: tpu7x:2x2x1
jax: 0.10.0
libtpu: 0.0.40
codegen_flags: <defaults>
</compile_context>

<pallas_src>
import functools
import math

import jax
import jax.numpy as jnp
from jax import lax
from jax.experimental import pallas as pl
from jax.experimental.pallas import tpu as pltpu

# ---- small config (gpt-nano-ish, chosen for the synthetic test) ----
N_LAYER = 2
N_HEAD = 4
N_EMBD = 32
BLOCK_SIZE = 8     # max sequence length (== T below)
VOCAB = 128
EPS = 1e-5
NEG_INF = -1e30    # finite mask constant (avoids -inf arithmetic edge cases)

USE_BF16_MATMUL = False   # v6e/v7x: cast MXU operands to bf16 (f32 accum)

# Row layout of the packed per-layer vector slab: (L, N_VEC_ROWS, 4*C).
# C-wide vectors live in lanes [0:C]; b_fc uses the full 4*C lanes.
VEC_LN1_G, VEC_LN1_B = 0, 1
VEC_BQ, VEC_BK, VEC_BV = 2, 3, 4
VEC_BPROJ = 5
VEC_LN2_G, VEC_LN2_B = 6, 7
VEC_BFC = 8
VEC_BFP = 9
N_VEC_ROWS = 10


# ----------------------------- kernel helpers -----------------------------
def _layernorm(x, g, b):
    mu = jnp.mean(x, axis=-1, keepdims=True)
    xc = x - mu
    var = jnp.mean(xc * xc, axis=-1, keepdims=True)
    return xc * lax.rsqrt(var + EPS) * g + b


def _new_gelu(x):
    c = math.sqrt(2.0 / math.pi)
    return 0.5 * x * (1.0 + jnp.tanh(c * (x + 0.044715 * x * x * x)))


def _mm(a, b):
    """MXU matmul with f32 accumulation; optional bf16 operands (v6e/v7x)."""
    if USE_BF16_MATMUL:
        a = a.astype(jnp.bfloat16)
        b = b.astype(jnp.bfloat16)
    return jnp.dot(a, b, preferred_element_type=jnp.float32)


# ----------------------------- fused Pallas kernel -----------------------------
def gpt_kernel(x0_ref, wattn_ref, wfc_ref, wfp_ref, vec_ref,
               lnf_ref, wlm_ref,
               logits_ref,
               x_vmem, *, batch, seq):
    """One transformer block per grid step; final LN + lm_head on the last."""
    layer = pl.program_id(0)
    C = N_EMBD
    hd = C // N_HEAD
    scale = 1.0 / math.sqrt(hd)
    B, T = batch, seq
    BT = B * T

    # Load the embeddings into the resident VMEM activation buffer once.
    @pl.when(layer == 0)
    def _():
        x_vmem[...] = x0_ref[...]

    x = x_vmem[...]                              # (B*T, C) f32, resident

    # ---- packed per-layer vector params (one 8 KiB DMA instead of 12) ----
    vecs = vec_ref[0]                            # (N_VEC_ROWS, 4C)
    ln1_g = vecs[VEC_LN1_G:VEC_LN1_G + 1, :C]
    ln1_b = vecs[VEC_LN1_B:VEC_LN1_B + 1, :C]
    b_q = vecs[VEC_BQ:VEC_BQ + 1, :C]
    b_k = vecs[VEC_BK:VEC_BK + 1, :C]
    b_v = vecs[VEC_BV:VEC_BV + 1, :C]
    b_pr = vecs[VEC_BPROJ:VEC_BPROJ + 1, :C]
    ln2_g = vecs[VEC_LN2_G:VEC_LN2_G + 1, :C]
    ln2_b = vecs[VEC_LN2_B:VEC_LN2_B + 1, :C]
    b_fc = vecs[VEC_BFC:VEC_BFC + 1, :]          # (1, 4C)
    b_fp = vecs[VEC_BFP:VEC_BFP + 1, :C]

    # ---- causal self-attention ----
    xn = _layernorm(x, ln1_g, ln1_b)
    w_attn = wattn_ref[0]                        # (C, 4C) = [Wq | Wk | Wv | Wproj]
    qkvp = _mm(xn, w_attn)                       # (B*T, 4C): ONE fused MXU push
    q = (qkvp[:, 0:C] + b_q) * scale             # scale hoisted out of head loop
    k = qkvp[:, C:2 * C] + b_k
    v = qkvp[:, 2 * C:3 * C] + b_v

    # In-kernel (T, T) causal additive mask (no HBM mask input).
    rr = lax.broadcasted_iota(jnp.int32, (T, T), 0)
    cc = lax.broadcasted_iota(jnp.int32, (T, T), 1)
    mask = jnp.where(rr >= cc, jnp.float32(0.0), jnp.float32(NEG_INF))

    # Per-batch (T, T) attention: no wasted exp / row reductions on the
    # fully-masked cross-batch half of a flattened (BT, BT) score matrix.
    y_rows = []
    for b in range(B):                           # static unroll over batch
        rows = slice(b * T, (b + 1) * T)
        q_b, k_b, v_b = q[rows, :], k[rows, :], v[rows, :]   # (T, C)
        head_outs = []
        for h in range(N_HEAD):                  # static unroll over heads
            sl = slice(h * hd, (h + 1) * hd)
            qh, kh, vh = q_b[:, sl], k_b[:, sl], v_b[:, sl]  # (T, hd)
            # q @ k^T with the transpose fused into the contraction.
            att = lax.dot_general(qh, kh, (((1,), (1,)), ((), ())),
                                  preferred_element_type=jnp.float32)
            att = att + mask
            att = att - jnp.max(att, axis=-1, keepdims=True)
            p = jnp.exp(att)
            p = p / jnp.sum(p, axis=-1, keepdims=True)       # exact softmax
            head_outs.append(_mm(p, vh))                     # (T, hd)
        # Lane-concat heads into a (T, C) slab (cheap lane-masked writes).
        y_rows.append(jnp.concatenate(head_outs, axis=-1))
    y = jnp.concatenate(y_rows, axis=0)          # (B*T, C)

    # SINGLE output-projection matmul (was 4 per-head folds).
    attn_out = _mm(y, w_attn[:, 3 * C:4 * C]) + b_pr
    x = x + attn_out

    # ---- MLP ----
    xn2 = _layernorm(x, ln2_g, ln2_b)
    h1 = _new_gelu(_mm(xn2, wfc_ref[0]) + b_fc)  # (B*T, 4C)
    x = x + _mm(h1, wfp_ref[0]) + b_fp

    x_vmem[...] = x

    # ---- final LayerNorm + lm_head, only on the last layer step ----
    @pl.when(layer == pl.num_programs(0) - 1)
    def _():
        lnf = lnf_ref[...]                       # (2, C): [gain; bias]
        xf = _layernorm(x, lnf[0:1, :], lnf[1:2, :])
        logits_ref[...] = _mm(xf, wlm_ref[...])  # lane-dense (B*T, 128) store


# ----------------------------- wrapper -----------------------------
def _layer_spec(arr):
    """Stacked per-layer weight: block (1, ...) indexed by the layer axis."""
    return pl.BlockSpec((1,) + arr.shape[1:], lambda l: (l, 0, 0))


def _const_spec(arr):
    """Full-array block, constant index map (fetched once, stays resident)."""
    nd = arr.ndim
    return pl.BlockSpec(arr.shape, lambda l, _nd=nd: (0,) * _nd)


def gpt_forward(idx, params):
    """idx: (B, T) int32 token ids -> logits (B*T, VOCAB)."""
    B, T = idx.shape
    assert T <= BLOCK_SIZE
    C = N_EMBD
    BT = B * T
    V = params['w_lm'].shape[1]

    # Embedding gathers stay as plain-JAX glue; embd dropout = identity (eval).
    tok_emb = params['wte'][idx]                       # (B, T, C)
    pos_emb = params['wpe'][:T]                        # (T, C)
    x0 = (tok_emb + pos_emb[None, :, :]).reshape(BT, C).astype(jnp.float32)

    layer_arrs = [params['w_attn'], params['w_fc'], params['w_fp'],
                  params['vecs']]
    const_arrs = [params['lnf'], params['w_lm']]

    in_specs = ([_const_spec(x0)]
                + [_layer_spec(a) for a in layer_arrs]
                + [_const_spec(a) for a in const_arrs])

    kernel = functools.partial(gpt_kernel, batch=B, seq=T)

    logits = pl.pallas_call(
        kernel,
        out_shape=jax.ShapeDtypeStruct((BT, V), jnp.float32),
        grid_spec=pltpu.PrefetchScalarGridSpec(
            num_scalar_prefetch=0,
            grid=(N_LAYER,),                     # sequential layer loop
            in_specs=in_specs,
            out_specs=pl.BlockSpec((BT, V), lambda l: (0, 0)),
            scratch_shapes=[pltpu.VMEM((BT, C), jnp.float32)]),
        compiler_params=pltpu.CompilerParams(
            dimension_semantics=("arbitrary",)),
    )(x0, *layer_arrs, *const_arrs)
    return logits


# ------------------ param init (matches PyTorch _init_weights) ------------------
def init_params(key):
    C, L, V = N_EMBD, N_LAYER, VOCAB
    W4 = 4 * C
    std = 0.02
    proj_std = 0.02 / math.sqrt(2 * L)
    ks = jax.random.split(key, 9)

    # Linear weights stored as (in, out) so y = x @ W + b matches nn.Linear.
    wq = std * jax.random.normal(ks[0], (L, C, C), jnp.float32)
    wk = std * jax.random.normal(ks[1], (L, C, C), jnp.float32)
    wv = std * jax.random.normal(ks[2], (L, C, C), jnp.float32)
    wpr = proj_std * jax.random.normal(ks[3], (L, C, C), jnp.float32)
    w_attn = jnp.concatenate([wq, wk, wv, wpr], axis=-1)     # (L, C, 4C)

    w_fc = std * jax.random.normal(ks[4], (L, C, W4), jnp.float32)
    w_fp = proj_std * jax.random.normal(ks[5], (L, W4, C), jnp.float32)

    # Packed per-layer vectors: LayerNorm gains = 1, all biases = 0 at init.
    vecs = jnp.zeros((L, N_VEC_ROWS, W4), jnp.float32)
    vecs = vecs.at[:, VEC_LN1_G, :C].set(1.0)
    vecs = vecs.at[:, VEC_LN2_G, :C].set(1.0)

    lnf = jnp.concatenate([jnp.ones((1, C), jnp.float32),
                           jnp.zeros((1, C), jnp.float32)], axis=0)

    return {
        'wte': std * jax.random.normal(ks[6], (V, C), jnp.float32),
        'wpe': std * jax.random.normal(ks[7], (BLOCK_SIZE, C), jnp.float32),
        'w_attn': w_attn,
        'w_fc': w_fc,
        'w_fp': w_fp,
        'vecs': vecs,
        'lnf': lnf,
        'w_lm': std * jax.random.normal(ks[8], (C, V), jnp.float32),
    }


# ----------------------------- main -----------------------------
if __name__ == "__main__":
    key = jax.random.PRNGKey(0)
    pkey, ikey = jax.random.split(key)
    params = init_params(pkey)

    B, T = 2, BLOCK_SIZE
    idx = jax.random.randint(ikey, (B, T), 0, VOCAB, dtype=jnp.int32)

    logits = jax.jit(gpt_forward)(idx, params)
    jax.block_until_ready(logits)

    assert logits.shape == (B * T, VOCAB)
    assert bool(jnp.all(jnp.isfinite(logits)))
    print("KERNEL_OK")
</pallas_src>

<mosaic_0001>
module attributes {stable_mosaic.version = 11 : i64} {
  func.func @gpt_kernel(%arg0: i32, %arg1: memref<16x32xf32, #tpu.memory_space<vmem>>, %arg2: memref<1x32x128xf32, #tpu.memory_space<vmem>>, %arg3: memref<1x32x128xf32, #tpu.memory_space<vmem>>, %arg4: memref<1x128x32xf32, #tpu.memory_space<vmem>>, %arg5: memref<1x10x128xf32, #tpu.memory_space<vmem>>, %arg6: memref<2x32xf32, #tpu.memory_space<vmem>>, %arg7: memref<32x128xf32, #tpu.memory_space<vmem>>, %arg8: memref<16x128xf32, #tpu.memory_space<vmem>>, %arg9: memref<16x32xf32, #tpu.memory_space<vmem>>) attributes {dimension_semantics = [#tpu.dimension_semantics<arbitrary>], iteration_bounds = array<i64: 2>, scalar_prefetch = 0 : i64, scratch_operands = 1 : i64, tpu.core_type = #tpu.core_type<tc>, window_params = [{pipeline_mode = #tpu.pipeline_mode<synchronous>, transform_indices = @transform_0, window_bounds = array<i64: 16, 32>}, {transform_indices = @transform_1, window_bounds = array<i64: 1, 32, 128>}, {transform_indices = @transform_2, window_bounds = array<i64: 1, 32, 128>}, {transform_indices = @transform_3, window_bounds = array<i64: 1, 128, 32>}, {transform_indices = @transform_4, window_bounds = array<i64: 1, 10, 128>}, {pipeline_mode = #tpu.pipeline_mode<synchronous>, transform_indices = @transform_5, window_bounds = array<i64: 2, 32>}, {pipeline_mode = #tpu.pipeline_mode<synchronous>, transform_indices = @transform_6, window_bounds = array<i64: 32, 128>}, {pipeline_mode = #tpu.pipeline_mode<synchronous>, transform_indices = @transform_7, window_bounds = array<i64: 16, 128>}]} {
    %c0_i32 = arith.constant 0 : i32
    %0 = arith.cmpi eq, %arg0, %c0_i32 : i32
    %1 = arith.extui %0 : i1 to i32
    %c0_i32_0 = arith.constant 0 : i32
    %2 = arith.cmpi ne, %1, %c0_i32_0 : i32
    scf.if %2 {
      %c0_69 = arith.constant 0 : index
      %c0_70 = arith.constant 0 : index
      %238 = vector.load %arg1[%c0_69, %c0_70] : memref<16x32xf32, #tpu.memory_space<vmem>>, vector<16x32xf32>
      %c0_71 = arith.constant 0 : index
      %c0_72 = arith.constant 0 : index
      %239 = vector.load %arg9[%c0_71, %c0_72] : memref<16x32xf32, #tpu.memory_space<vmem>>, vector<16x32xf32>
      tpu.vector_store %arg9[%c0_71, %c0_72], %238 {strides = array<i32>} : memref<16x32xf32, #tpu.memory_space<vmem>>, vector<16x32xf32>,
    } else {
    }
    %c0 = arith.constant 0 : index
    %c0_1 = arith.constant 0 : index
    %3 = vector.load %arg9[%c0, %c0_1] : memref<16x32xf32, #tpu.memory_space<vmem>>, vector<16x32xf32>
    %c0_2 = arith.constant 0 : index
    %c0_3 = arith.constant 0 : index
    %c0_4 = arith.constant 0 : index
    %4 = vector.load %arg5[%c0_2, %c0_3, %c0_4] : memref<1x10x128xf32, #tpu.memory_space<vmem>>, vector<1x10x128xf32>
    %5 = vector.shape_cast %4 : vector<1x10x128xf32> to vector<10x128xf32>
    %6 = vector.extract_strided_slice %5 {offsets = [0, 0], sizes = [1, 32], strides = [1, 1]} : vector<10x128xf32> to vector<1x32xf32>
    %7 = vector.extract_strided_slice %5 {offsets = [1, 0], sizes = [1, 32], strides = [1, 1]} : vector<10x128xf32> to vector<1x32xf32>
    %8 = vector.extract_strided_slice %5 {offsets = [2, 0], sizes = [1, 32], strides = [1, 1]} : vector<10x128xf32> to vector<1x32xf32>
    %9 = vector.extract_strided_slice %5 {offsets = [3, 0], sizes = [1, 32], strides = [1, 1]} : vector<10x128xf32> to vector<1x32xf32>
    %10 = vector.extract_strided_slice %5 {offsets = [4, 0], sizes = [1, 32], strides = [1, 1]} : vector<10x128xf32> to vector<1x32xf32>
    %11 = vector.extract_strided_slice %5 {offsets = [5, 0], sizes = [1, 32], strides = [1, 1]} : vector<10x128xf32> to vector<1x32xf32>
    %12 = vector.extract_strided_slice %5 {offsets = [6, 0], sizes = [1, 32], strides = [1, 1]} : vector<10x128xf32> to vector<1x32xf32>
    %13 = vector.extract_strided_slice %5 {offsets = [7, 0], sizes = [1, 32], strides = [1, 1]} : vector<10x128xf32> to vector<1x32xf32>
    %14 = vector.extract_strided_slice %5 {offsets = [8, 0], sizes = [1, 128], strides = [1, 1]} : vector<10x128xf32> to vector<1x128xf32>
    %15 = vector.extract_strided_slice %5 {offsets = [9, 0], sizes = [1, 32], strides = [1, 1]} : vector<10x128xf32> to vector<1x32xf32>
    %cst = arith.constant dense<0.000000e+00> : vector<16xf32>
    %16 = vector.multi_reduction <add>, %3, %cst [1] : vector<16x32xf32> to vector<16xf32>
    %17 = vector.shape_cast %16 : vector<16xf32> to vector<16x1xf32>
    %cst_5 = arith.constant 3.200000e+01 : f32
    %18 = vector.broadcast %cst_5 : f32 to vector<16x1xf32>
    %19 = arith.divf %17, %18 : vector<16x1xf32>
    %20 = vector.broadcast %19 : vector<16x1xf32> to vector<16x32xf32>
    %21 = arith.subf %3, %20 : vector<16x32xf32>
    %22 = arith.mulf %21, %21 : vector<16x32xf32>
    %cst_6 = arith.constant dense<0.000000e+00> : vector<16xf32>
    %23 = vector.multi_reduction <add>, %22, %cst_6 [1] : vector<16x32xf32> to vector<16xf32>
    %24 = vector.shape_cast %23 : vector<16xf32> to vector<16x1xf32>
    %cst_7 = arith.constant 3.200000e+01 : f32
    %25 = vector.broadcast %cst_7 : f32 to vector<16x1xf32>
    %26 = arith.divf %24, %25 : vector<16x1xf32>
    %cst_8 = arith.constant 9.99999974E-6 : f32
    %27 = vector.broadcast %cst_8 : f32 to vector<16x1xf32>
    %28 = arith.addf %26, %27 : vector<16x1xf32>
    %29 = math.rsqrt %28 : vector<16x1xf32>
    %30 = vector.broadcast %29 : vector<16x1xf32> to vector<16x32xf32>
    %31 = arith.mulf %21, %30 : vector<16x32xf32>
    %32 = vector.broadcast %6 : vector<1x32xf32> to vector<16x32xf32>
    %33 = arith.mulf %31, %32 : vector<16x32xf32>
    %34 = vector.broadcast %7 : vector<1x32xf32> to vector<16x32xf32>
    %35 = arith.addf %33, %34 : vector<16x32xf32>
    %c0_9 = arith.constant 0 : index
    %c0_10 = arith.constant 0 : index
    %c0_11 = arith.constant 0 : index
    %36 = vector.load %arg2[%c0_9, %c0_10, %c0_11] : memref<1x32x128xf32, #tpu.memory_space<vmem>>, vector<1x32x128xf32>
    %37 = vector.shape_cast %36 : vector<1x32x128xf32> to vector<32x128xf32>
    %cst_12 = arith.constant dense<0.000000e+00> : vector<16x128xf32>
    %38 = tpu.matmul %35, %37, %cst_12 {dimension_numbers = #tpu.dot_dimension_numbers<[1], [0], [0], [1], [0, 0, 1, 1], [], []>} : vector<16x32xf32>, vector<32x128xf32>, vector<16x128xf32> -> vector<16x128xf32>
    %39 = vector.extract_strided_slice %38 {offsets = [0, 0], sizes = [16, 32], strides = [1, 1]} : vector<16x128xf32> to vector<16x32xf32>
    %40 = vector.broadcast %8 : vector<1x32xf32> to vector<16x32xf32>
    %41 = arith.addf %39, %40 : vector<16x32xf32>
    %cst_13 = arith.constant 0.353553385 : f32
    %42 = vector.broadcast %cst_13 : f32 to vector<16x32xf32>
    %43 = arith.mulf %41, %42 : vector<16x32xf32>
    %44 = vector.extract_strided_slice %38 {offsets = [0, 32], sizes = [16, 32], strides = [1, 1]} : vector<16x128xf32> to vector<16x32xf32>
    %45 = vector.broadcast %9 : vector<1x32xf32> to vector<16x32xf32>
    %46 = arith.addf %44, %45 : vector<16x32xf32>
    %47 = vector.extract_strided_slice %38 {offsets = [0, 64], sizes = [16, 32], strides = [1, 1]} : vector<16x128xf32> to vector<16x32xf32>
    %48 = vector.broadcast %10 : vector<1x32xf32> to vector<16x32xf32>
    %49 = arith.addf %47, %48 : vector<16x32xf32>
    %50 = tpu.iota {dimensions = array<i32: 0>} : vector<8x8xi32>
    %51 = tpu.iota {dimensions = array<i32: 1>} : vector<8x8xi32>
    %52 = arith.cmpi sge, %50, %51 : vector<8x8xi32>
    %cst_14 = arith.constant 0.000000e+00 : f32
    %cst_15 = arith.constant -1.000000e+30 : f32
    %53 = vector.broadcast %cst_14 : f32 to vector<8x8xf32>
    %54 = vector.broadcast %cst_15 : f32 to vector<8x8xf32>
    %55 = arith.select %52, %53, %54 : vector<8x8xi1>, vector<8x8xf32>
    %56 = vector.extract_strided_slice %43 {offsets = [0, 0], sizes = [8, 32], strides = [1, 1]} : vector<16x32xf32> to vector<8x32xf32>
    %57 = vector.extract_strided_slice %46 {offsets = [0, 0], sizes = [8, 32], strides = [1, 1]} : vector<16x32xf32> to vector<8x32xf32>
    %58 = vector.extract_strided_slice %49 {offsets = [0, 0], sizes = [8, 32], strides = [1, 1]} : vector<16x32xf32> to vector<8x32xf32>
    %59 = vector.extract_strided_slice %56 {offsets = [0, 0], sizes = [8, 8], strides = [1, 1]} : vector<8x32xf32> to vector<8x8xf32>
    %60 = vector.extract_strided_slice %57 {offsets = [0, 0], sizes = [8, 8], strides = [1, 1]} : vector<8x32xf32> to vector<8x8xf32>
    %61 = vector.extract_strided_slice %58 {offsets = [0, 0], sizes = [8, 8], strides = [1, 1]} : vector<8x32xf32> to vector<8x8xf32>
    %cst_16 = arith.constant dense<0.000000e+00> : vector<8x8xf32>
    %62 = tpu.matmul %59, %60, %cst_16 {dimension_numbers = #tpu.dot_dimension_numbers<[1], [1], [0], [0], [0, 0, 1, 0], [], []>} : vector<8x8xf32>, vector<8x8xf32>, vector<8x8xf32> -> vector<8x8xf32>
    %63 = arith.addf %62, %55 : vector<8x8xf32>
    %cst_17 = arith.constant dense<0xFF800000> : vector<8xf32>
    %64 = vector.multi_reduction <maximumf>, %63, %cst_17 [1] : vector<8x8xf32> to vector<8xf32>
    %65 = vector.shape_cast %64 : vector<8xf32> to vector<8x1xf32>
    %66 = vector.broadcast %65 : vector<8x1xf32> to vector<8x8xf32>
    %67 = arith.subf %63, %66 : vector<8x8xf32>
    %68 = math.exp %67 : vector<8x8xf32>
    %cst_18 = arith.constant dense<0.000000e+00> : vector<8xf32>
    %69 = vector.multi_reduction <add>, %68, %cst_18 [1] : vector<8x8xf32> to vector<8xf32>
    %70 = vector.shape_cast %69 : vector<8xf32> to vector<8x1xf32>
    %71 = vector.broadcast %70 : vector<8x1xf32> to vector<8x8xf32>
    %72 = arith.divf %68, %71 : vector<8x8xf32>
    %cst_19 = arith.constant dense<0.000000e+00> : vector<8x8xf32>
    %73 = tpu.matmul %72, %61, %cst_19 {dimension_numbers = #tpu.dot_dimension_numbers<[1], [0], [0], [1], [0, 0, 1, 1], [], []>} : vector<8x8xf32>, vector<8x8xf32>, vector<8x8xf32> -> vector<8x8xf32>
    %74 = vector.extract_strided_slice %56 {offsets = [0, 8], sizes = [8, 8], strides = [1, 1]} : vector<8x32xf32> to vector<8x8xf32>
    %75 = vector.extract_strided_slice %57 {offsets = [0, 8], sizes = [8, 8], strides = [1, 1]} : vector<8x32xf32> to vector<8x8xf32>
    %76 = vector.extract_strided_slice %58 {offsets = [0, 8], sizes = [8, 8], strides = [1, 1]} : vector<8x32xf32> to vector<8x8xf32>
    %cst_20 = arith.constant dense<0.000000e+00> : vector<8x8xf32>
    %77 = tpu.matmul %74, %75, %cst_20 {dimension_numbers = #tpu.dot_dimension_numbers<[1], [1], [0], [0], [0, 0, 1, 0], [], []>} : vector<8x8xf32>, vector<8x8xf32>, vector<8x8xf32> -> vector<8x8xf32>
    %78 = arith.addf %77, %55 : vector<8x8xf32>
    %cst_21 = arith.constant dense<0xFF800000> : vector<8xf32>
    %79 = vector.multi_reduction <maximumf>, %78, %cst_21 [1] : vector<8x8xf32> to vector<8xf32>
    %80 = vector.shape_cast %79 : vector<8xf32> to vector<8x1xf32>
    %81 = vector.broadcast %80 : vector<8x1xf32> to vector<8x8xf32>
    %82 = arith.subf %78, %81 : vector<8x8xf32>
    %83 = math.exp %82 : vector<8x8xf32>
    %cst_22 = arith.constant dense<0.000000e+00> : vector<8xf32>
    %84 = vector.multi_reduction <add>, %83, %cst_22 [1] : vector<8x8xf32> to vector<8xf32>
    %85 = vector.shape_cast %84 : vector<8xf32> to vector<8x1xf32>
    %86 = vector.broadcast %85 : vector<8x1xf32> to vector<8x8xf32>
    %87 = arith.divf %83, %86 : vector<8x8xf32>
    %cst_23 = arith.constant dense<0.000000e+00> : vector<8x8xf32>
    %88 = tpu.matmul %87, %76, %cst_23 {dimension_numbers = #tpu.dot_dimension_numbers<[1], [0], [0], [1], [0, 0, 1, 1], [], []>} : vector<8x8xf32>, vector<8x8xf32>, vector<8x8xf32> -> vector<8x8xf32>
    %89 = vector.extract_strided_slice %56 {offsets = [0, 16], sizes = [8, 8], strides = [1, 1]} : vector<8x32xf32> to vector<8x8xf32>
    %90 = vector.extract_strided_slice %57 {offsets = [0, 16], sizes = [8, 8], strides = [1, 1]} : vector<8x32xf32> to vector<8x8xf32>
    %91 = vector.extract_strided_slice %58 {offsets = [0, 16], sizes = [8, 8], strides = [1, 1]} : vector<8x32xf32> to vector<8x8xf32>
    %cst_24 = arith.constant dense<0.000000e+00> : vector<8x8xf32>
    %92 = tpu.matmul %89, %90, %cst_24 {dimension_numbers = #tpu.dot_dimension_numbers<[1], [1], [0], [0], [0, 0, 1, 0], [], []>} : vector<8x8xf32>, vector<8x8xf32>, vector<8x8xf32> -> vector<8x8xf32>
    %93 = arith.addf %92, %55 : vector<8x8xf32>
    %cst_25 = arith.constant dense<0xFF800000> : vector<8xf32>
    %94 = vector.multi_reduction <maximumf>, %93, %cst_25 [1] : vector<8x8xf32> to vector<8xf32>
    %95 = vector.shape_cast %94 : vector<8xf32> to vector<8x1xf32>
    %96 = vector.broadcast %95 : vector<8x1xf32> to vector<8x8xf32>
    %97 = arith.subf %93, %96 : vector<8x8xf32>
    %98 = math.exp %97 : vector<8x8xf32>
    %cst_26 = arith.constant dense<0.000000e+00> : vector<8xf32>
    %99 = vector.multi_reduction <add>, %98, %cst_26 [1] : vector<8x8xf32> to vector<8xf32>
    %100 = vector.shape_cast %99 : vector<8xf32> to vector<8x1xf32>
    %101 = vector.broadcast %100 : vector<8x1xf32> to vector<8x8xf32>
    %102 = arith.divf %98, %101 : vector<8x8xf32>
    %cst_27 = arith.constant dense<0.000000e+00> : vector<8x8xf32>
    %103 = tpu.matmul %102, %91, %cst_27 {dimension_numbers = #tpu.dot_dimension_numbers<[1], [0], [0], [1], [0, 0, 1, 1], [], []>} : vector<8x8xf32>, vector<8x8xf32>, vector<8x8xf32> -> vector<8x8xf32>
    %104 = vector.extract_strided_slice %56 {offsets = [0, 24], sizes = [8, 8], strides = [1, 1]} : vector<8x32xf32> to vector<8x8xf32>
    %105 = vector.extract_strided_slice %57 {offsets = [0, 24], sizes = [8, 8], strides = [1, 1]} : vector<8x32xf32> to vector<8x8xf32>
    %106 = vector.extract_strided_slice %58 {offsets = [0, 24], sizes = [8, 8], strides = [1, 1]} : vector<8x32xf32> to vector<8x8xf32>
    %cst_28 = arith.constant dense<0.000000e+00> : vector<8x8xf32>
    %107 = tpu.matmul %104, %105, %cst_28 {dimension_numbers = #tpu.dot_dimension_numbers<[1], [1], [0], [0], [0, 0, 1, 0], [], []>} : vector<8x8xf32>, vector<8x8xf32>, vector<8x8xf32> -> vector<8x8xf32>
    %108 = arith.addf %107, %55 : vector<8x8xf32>
    %cst_29 = arith.constant dense<0xFF800000> : vector<8xf32>
    %109 = vector.multi_reduction <maximumf>, %108, %cst_29 [1] : vector<8x8xf32> to vector<8xf32>
    %110 = vector.shape_cast %109 : vector<8xf32> to vector<8x1xf32>
    %111 = vector.broadcast %110 : vector<8x1xf32> to vector<8x8xf32>
    %112 = arith.subf %108, %111 : vector<8x8xf32>
    %113 = math.exp %112 : vector<8x8xf32>
    %cst_30 = arith.constant dense<0.000000e+00> : vector<8xf32>
    %114 = vector.multi_reduction <add>, %113, %cst_30 [1] : vector<8x8xf32> to vector<8xf32>
    %115 = vector.shape_cast %114 : vector<8xf32> to vector<8x1xf32>
    %116 = vector.broadcast %115 : vector<8x1xf32> to vector<8x8xf32>
    %117 = arith.divf %113, %116 : vector<8x8xf32>
    %cst_31 = arith.constant dense<0.000000e+00> : vector<8x8xf32>
    %118 = tpu.matmul %117, %106, %cst_31 {dimension_numbers = #tpu.dot_dimension_numbers<[1], [0], [0], [1], [0, 0, 1, 1], [], []>} : vector<8x8xf32>, vector<8x8xf32>, vector<8x8xf32> -> vector<8x8xf32>
    %119 = tpu.concatenate %73, %88, %103, %118 in 1 : vector<8x8xf32>, vector<8x8xf32>, vector<8x8xf32>, vector<8x8xf32> -> vector<8x32xf32>
    %120 = vector.extract_strided_slice %43 {offsets = [8, 0], sizes = [8, 32], strides = [1, 1]} : vector<16x32xf32> to vector<8x32xf32>
    %121 = vector.extract_strided_slice %46 {offsets = [8, 0], sizes = [8, 32], strides = [1, 1]} : vector<16x32xf32> to vector<8x32xf32>
    %122 = vector.extract_strided_slice %49 {offsets = [8, 0], sizes = [8, 32], strides = [1, 1]} : vector<16x32xf32> to vector<8x32xf32>
    %123 = vector.extract_strided_slice %120 {offsets = [0, 0], sizes = [8, 8], strides = [1, 1]} : vector<8x32xf32> to vector<8x8xf32>
    %124 = vector.extract_strided_slice %121 {offsets = [0, 0], sizes = [8, 8], strides = [1, 1]} : vector<8x32xf32> to vector<8x8xf32>
    %125 = vector.extract_strided_slice %122 {offsets = [0, 0], sizes = [8, 8], strides = [1, 1]} : vector<8x32xf32> to vector<8x8xf32>
    %cst_32 = arith.constant dense<0.000000e+00> : vector<8x8xf32>
    %126 = tpu.matmul %123, %124, %cst_32 {dimension_numbers = #tpu.dot_dimension_numbers<[1], [1], [0], [0], [0, 0, 1, 0], [], []>} : vector<8x8xf32>, vector<8x8xf32>, vector<8x8xf32> -> vector<8x8xf32>
    %127 = arith.addf %126, %55 : vector<8x8xf32>
    %cst_33 = arith.constant dense<0xFF800000> : vector<8xf32>
    %128 = vector.multi_reduction <maximumf>, %127, %cst_33 [1] : vector<8x8xf32> to vector<8xf32>
    %129 = vector.shape_cast %128 : vector<8xf32> to vector<8x1xf32>
    %130 = vector.broadcast %129 : vector<8x1xf32> to vector<8x8xf32>
    %131 = arith.subf %127, %130 : vector<8x8xf32>
    %132 = math.exp %131 : vector<8x8xf32>
    %cst_34 = arith.constant dense<0.000000e+00> : vector<8xf32>
    %133 = vector.multi_reduction <add>, %132, %cst_34 [1] : vector<8x8xf32> to vector<8xf32>
    %134 = vector.shape_cast %133 : vector<8xf32> to vector<8x1xf32>
    %135 = vector.broadcast %134 : vector<8x1xf32> to vector<8x8xf32>
    %136 = arith.divf %132, %135 : vector<8x8xf32>
    %cst_35 = arith.constant dense<0.000000e+00> : vector<8x8xf32>
    %137 = tpu.matmul %136, %125, %cst_35 {dimension_numbers = #tpu.dot_dimension_numbers<[1], [0], [0], [1], [0, 0, 1, 1], [], []>} : vector<8x8xf32>, vector<8x8xf32>, vector<8x8xf32> -> vector<8x8xf32>
    %138 = vector.extract_strided_slice %120 {offsets = [0, 8], sizes = [8, 8], strides = [1, 1]} : vector<8x32xf32> to vector<8x8xf32>
    %139 = vector.extract_strided_slice %121 {offsets = [0, 8], sizes = [8, 8], strides = [1, 1]} : vector<8x32xf32> to vector<8x8xf32>
    %140 = vector.extract_strided_slice %122 {offsets = [0, 8], sizes = [8, 8], strides = [1, 1]} : vector<8x32xf32> to vector<8x8xf32>
    %cst_36 = arith.constant dense<0.000000e+00> : vector<8x8xf32>
    %141 = tpu.matmul %138, %139, %cst_36 {dimension_numbers = #tpu.dot_dimension_numbers<[1], [1], [0], [0], [0, 0, 1, 0], [], []>} : vector<8x8xf32>, vector<8x8xf32>, vector<8x8xf32> -> vector<8x8xf32>
    %142 = arith.addf %141, %55 : vector<8x8xf32>
    %cst_37 = arith.constant dense<0xFF800000> : vector<8xf32>
    %143 = vector.multi_reduction <maximumf>, %142, %cst_37 [1] : vector<8x8xf32> to vector<8xf32>
    %144 = vector.shape_cast %143 : vector<8xf32> to vector<8x1xf32>
    %145 = vector.broadcast %144 : vector<8x1xf32> to vector<8x8xf32>
    %146 = arith.subf %142, %145 : vector<8x8xf32>
    %147 = math.exp %146 : vector<8x8xf32>
    %cst_38 = arith.constant dense<0.000000e+00> : vector<8xf32>
    %148 = vector.multi_reduction <add>, %147, %cst_38 [1] : vector<8x8xf32> to vector<8xf32>
    %149 = vector.shape_cast %148 : vector<8xf32> to vector<8x1xf32>
    %150 = vector.broadcast %149 : vector<8x1xf32> to vector<8x8xf32>
    %151 = arith.divf %147, %150 : vector<8x8xf32>
    %cst_39 = arith.constant dense<0.000000e+00> : vector<8x8xf32>
    %152 = tpu.matmul %151, %140, %cst_39 {dimension_numbers = #tpu.dot_dimension_numbers<[1], [0], [0], [1], [0, 0, 1, 1], [], []>} : vector<8x8xf32>, vector<8x8xf32>, vector<8x8xf32> -> vector<8x8xf32>
    %153 = vector.extract_strided_slice %120 {offsets = [0, 16], sizes = [8, 8], strides = [1, 1]} : vector<8x32xf32> to vector<8x8xf32>
    %154 = vector.extract_strided_slice %121 {offsets = [0, 16], sizes = [8, 8], strides = [1, 1]} : vector<8x32xf32> to vector<8x8xf32>
    %155 = vector.extract_strided_slice %122 {offsets = [0, 16], sizes = [8, 8], strides = [1, 1]} : vector<8x32xf32> to vector<8x8xf32>
    %cst_40 = arith.constant dense<0.000000e+00> : vector<8x8xf32>
    %156 = tpu.matmul %153, %154, %cst_40 {dimension_numbers = #tpu.dot_dimension_numbers<[1], [1], [0], [0], [0, 0, 1, 0], [], []>} : vector<8x8xf32>, vector<8x8xf32>, vector<8x8xf32> -> vector<8x8xf32>
    %157 = arith.addf %156, %55 : vector<8x8xf32>
    %cst_41 = arith.constant dense<0xFF800000> : vector<8xf32>
    %158 = vector.multi_reduction <maximumf>, %157, %cst_41 [1] : vector<8x8xf32> to vector<8xf32>
    %159 = vector.shape_cast %158 : vector<8xf32> to vector<8x1xf32>
    %160 = vector.broadcast %159 : vector<8x1xf32> to vector<8x8xf32>
    %161 = arith.subf %157, %160 : vector<8x8xf32>
    %162 = math.exp %161 : vector<8x8xf32>
    %cst_42 = arith.constant dense<0.000000e+00> : vector<8xf32>
    %163 = vector.multi_reduction <add>, %162, %cst_42 [1] : vector<8x8xf32> to vector<8xf32>
    %164 = vector.shape_cast %163 : vector<8xf32> to vector<8x1xf32>
    %165 = vector.broadcast %164 : vector<8x1xf32> to vector<8x8xf32>
    %166 = arith.divf %162, %165 : vector<8x8xf32>
    %cst_43 = arith.constant dense<0.000000e+00> : vector<8x8xf32>
    %167 = tpu.matmul %166, %155, %cst_43 {dimension_numbers = #tpu.dot_dimension_numbers<[1], [0], [0], [1], [0, 0, 1, 1], [], []>} : vector<8x8xf32>, vector<8x8xf32>, vector<8x8xf32> -> vector<8x8xf32>
    %168 = vector.extract_strided_slice %120 {offsets = [0, 24], sizes = [8, 8], strides = [1, 1]} : vector<8x32xf32> to vector<8x8xf32>
    %169 = vector.extract_strided_slice %121 {offsets = [0, 24], sizes = [8, 8], strides = [1, 1]} : vector<8x32xf32> to vector<8x8xf32>
    %170 = vector.extract_strided_slice %122 {offsets = [0, 24], sizes = [8, 8], strides = [1, 1]} : vector<8x32xf32> to vector<8x8xf32>
    %cst_44 = arith.constant dense<0.000000e+00> : vector<8x8xf32>
    %171 = tpu.matmul %168, %169, %cst_44 {dimension_numbers = #tpu.dot_dimension_numbers<[1], [1], [0], [0], [0, 0, 1, 0], [], []>} : vector<8x8xf32>, vector<8x8xf32>, vector<8x8xf32> -> vector<8x8xf32>
    %172 = arith.addf %171, %55 : vector<8x8xf32>
    %cst_45 = arith.constant dense<0xFF800000> : vector<8xf32>
    %173 = vector.multi_reduction <maximumf>, %172, %cst_45 [1] : vector<8x8xf32> to vector<8xf32>
    %174 = vector.shape_cast %173 : vector<8xf32> to vector<8x1xf32>
    %175 = vector.broadcast %174 : vector<8x1xf32> to vector<8x8xf32>
    %176 = arith.subf %172, %175 : vector<8x8xf32>
    %177 = math.exp %176 : vector<8x8xf32>
    %cst_46 = arith.constant dense<0.000000e+00> : vector<8xf32>
    %178 = vector.multi_reduction <add>, %177, %cst_46 [1] : vector<8x8xf32> to vector<8xf32>
    %179 = vector.shape_cast %178 : vector<8xf32> to vector<8x1xf32>
    %180 = vector.broadcast %179 : vector<8x1xf32> to vector<8x8xf32>
    %181 = arith.divf %177, %180 : vector<8x8xf32>
    %cst_47 = arith.constant dense<0.000000e+00> : vector<8x8xf32>
    %182 = tpu.matmul %181, %170, %cst_47 {dimension_numbers = #tpu.dot_dimension_numbers<[1], [0], [0], [1], [0, 0, 1, 1], [], []>} : vector<8x8xf32>, vector<8x8xf32>, vector<8x8xf32> -> vector<8x8xf32>
    %183 = tpu.concatenate %137, %152, %167, %182 in 1 : vector<8x8xf32>, vector<8x8xf32>, vector<8x8xf32>, vector<8x8xf32> -> vector<8x32xf32>
    %184 = tpu.concatenate %119, %183 in 0 : vector<8x32xf32>, vector<8x32xf32> -> vector<16x32xf32>
    %185 = vector.extract_strided_slice %37 {offsets = [0, 96], sizes = [32, 32], strides = [1, 1]} : vector<32x128xf32> to vector<32x32xf32>
    %cst_48 = arith.constant dense<0.000000e+00> : vector<16x32xf32>
    %186 = tpu.matmul %184, %185, %cst_48 {dimension_numbers = #tpu.dot_dimension_numbers<[1], [0], [0], [1], [0, 0, 1, 1], [], []>} : vector<16x32xf32>, vector<32x32xf32>, vector<16x32xf32> -> vector<16x32xf32>
    %187 = vector.broadcast %11 : vector<1x32xf32> to vector<16x32xf32>
    %188 = arith.addf %186, %187 : vector<16x32xf32>
    %189 = arith.addf %3, %188 : vector<16x32xf32>
    %cst_49 = arith.constant dense<0.000000e+00> : vector<16xf32>
    %190 = vector.multi_reduction <add>, %189, %cst_49 [1] : vector<16x32xf32> to vector<16xf32>
    %191 = vector.shape_cast %190 : vector<16xf32> to vector<16x1xf32>
    %cst_50 = arith.constant 3.200000e+01 : f32
    %192 = vector.broadcast %cst_50 : f32 to vector<16x1xf32>
    %193 = arith.divf %191, %192 : vector<16x1xf32>
    %194 = vector.broadcast %193 : vector<16x1xf32> to vector<16x32xf32>
    %195 = arith.subf %189, %194 : vector<16x32xf32>
    %196 = arith.mulf %195, %195 : vector<16x32xf32>
    %cst_51 = arith.constant dense<0.000000e+00> : vector<16xf32>
    %197 = vector.multi_reduction <add>, %196, %cst_51 [1] : vector<16x32xf32> to vector<16xf32>
    %198 = vector.shape_cast %197 : vector<16xf32> to vector<16x1xf32>
    %cst_52 = arith.constant 3.200000e+01 : f32
    %199 = vector.broadcast %cst_52 : f32 to vector<16x1xf32>
    %200 = arith.divf %198, %199 : vector<16x1xf32>
    %cst_53 = arith.constant 9.99999974E-6 : f32
    %201 = vector.broadcast %cst_53 : f32 to vector<16x1xf32>
    %202 = arith.addf %200, %201 : vector<16x1xf32>
    %203 = math.rsqrt %202 : vector<16x1xf32>
    %204 = vector.broadcast %203 : vector<16x1xf32> to vector<16x32xf32>
    %205 = arith.mulf %195, %204 : vector<16x32xf32>
    %206 = vector.broadcast %12 : vector<1x32xf32> to vector<16x32xf32>
    %207 = arith.mulf %205, %206 : vector<16x32xf32>
    %208 = vector.broadcast %13 : vector<1x32xf32> to vector<16x32xf32>
    %209 = arith.addf %207, %208 : vector<16x32xf32>
    %c0_54 = arith.constant 0 : index
    %c0_55 = arith.constant 0 : index
    %c0_56 = arith.constant 0 : index
    %210 = vector.load %arg3[%c0_54, %c0_55, %c0_56] : memref<1x32x128xf32, #tpu.memory_space<vmem>>, vector<1x32x128xf32>
    %211 = vector.shape_cast %210 : vector<1x32x128xf32> to vector<32x128xf32>
    %cst_57 = arith.constant dense<0.000000e+00> : vector<16x128xf32>
    %212 = tpu.matmul %209, %211, %cst_57 {dimension_numbers = #tpu.dot_dimension_numbers<[1], [0], [0], [1], [0, 0, 1, 1], [], []>} : vector<16x32xf32>, vector<32x128xf32>, vector<16x128xf32> -> vector<16x128xf32>
    %213 = vector.broadcast %14 : vector<1x128xf32> to vector<16x128xf32>
    %214 = arith.addf %212, %213 : vector<16x128xf32>
    %cst_58 = arith.constant 5.000000e-01 : f32
    %215 = vector.broadcast %cst_58 : f32 to vector<16x128xf32>
    %216 = arith.mulf %215, %214 : vector<16x128xf32>
    %cst_59 = arith.constant 4.471500e-02 : f32
    %217 = vector.broadcast %cst_59 : f32 to vector<16x128xf32>
    %218 = arith.mulf %217, %214 : vector<16x128xf32>
    %219 = arith.mulf %218, %214 : vector<16x128xf32>
    %220 = arith.mulf %219, %214 : vector<16x128xf32>
    %221 = arith.addf %214, %220 : vector<16x128xf32>
    %cst_60 = arith.constant 0.797884583 : f32
    %222 = vector.broadcast %cst_60 : f32 to vector<16x128xf32>
    %223 = arith.mulf %222, %221 : vector<16x128xf32>
    %224 = math.tanh %223 : vector<16x128xf32>
    %cst_61 = arith.constant 1.000000e+00 : f32
    %225 = vector.broadcast %cst_61 : f32 to vector<16x128xf32>
    %226 = arith.addf %225, %224 : vector<16x128xf32>
    %227 = arith.mulf %216, %226 : vector<16x128xf32>
    %c0_62 = arith.constant 0 : index
    %c0_63 = arith.constant 0 : index
    %c0_64 = arith.constant 0 : index
    %228 = vector.load %arg4[%c0_62, %c0_63, %c0_64] : memref<1x128x32xf32, #tpu.memory_space<vmem>>, vector<1x128x32xf32>
    %229 = vector.shape_cast %228 : vector<1x128x32xf32> to vector<128x32xf32>
    %cst_65 = arith.constant dense<0.000000e+00> : vector<16x32xf32>
    %230 = tpu.matmul %227, %229, %cst_65 {dimension_numbers = #tpu.dot_dimension_numbers<[1], [0], [0], [1], [0, 0, 1, 1], [], []>} : vector<16x128xf32>, vector<128x32xf32>, vector<16x32xf32> -> vector<16x32xf32>
    %231 = arith.addf %189, %230 : vector<16x32xf32>
    %232 = vector.broadcast %15 : vector<1x32xf32> to vector<16x32xf32>
    %233 = arith.addf %231, %232 : vector<16x32xf32>
    %c0_66 = arith.constant 0 : index
    %c0_67 = arith.constant 0 : index
    %234 = vector.load %arg9[%c0_66, %c0_67] : memref<16x32xf32, #tpu.memory_space<vmem>>, vector<16x32xf32>
    tpu.vector_store %arg9[%c0_66, %c0_67], %233 {strides = array<i32>} : memref<16x32xf32, #tpu.memory_space<vmem>>, vector<16x32xf32>,
    %c1_i32 = arith.constant 1 : i32
    %235 = arith.cmpi eq, %arg0, %c1_i32 : i32
    %236 = arith.extui %235 : i1 to i32
    %c0_i32_68 = arith.constant 0 : i32
    %237 = arith.cmpi ne, %236, %c0_i32_68 : i32
    scf.if %237 {
      %c0_69 = arith.constant 0 : index
      %c0_70 = arith.constant 0 : index
      %238 = vector.load %arg6[%c0_69, %c0_70] : memref<2x32xf32, #tpu.memory_space<vmem>>, vector<2x32xf32>
      %239 = vector.extract_strided_slice %238 {offsets = [0, 0], sizes = [1, 32], strides = [1, 1]} : vector<2x32xf32> to vector<1x32xf32>
      %240 = vector.extract_strided_slice %238 {offsets = [1, 0], sizes = [1, 32], strides = [1, 1]} : vector<2x32xf32> to vector<1x32xf32>
      %cst_71 = arith.constant dense<0.000000e+00> : vector<16xf32>
      %241 = vector.multi_reduction <add>, %233, %cst_71 [1] : vector<16x32xf32> to vector<16xf32>
      %242 = vector.shape_cast %241 : vector<16xf32> to vector<16x1xf32>
      %cst_72 = arith.constant 3.200000e+01 : f32
      %243 = vector.broadcast %cst_72 : f32 to vector<16x1xf32>
      %244 = arith.divf %242, %243 : vector<16x1xf32>
      %245 = vector.broadcast %244 : vector<16x1xf32> to vector<16x32xf32>
      %246 = arith.subf %233, %245 : vector<16x32xf32>
      %247 = arith.mulf %246, %246 : vector<16x32xf32>
      %cst_73 = arith.constant dense<0.000000e+00> : vector<16xf32>
      %248 = vector.multi_reduction <add>, %247, %cst_73 [1] : vector<16x32xf32> to vector<16xf32>
      %249 = vector.shape_cast %248 : vector<16xf32> to vector<16x1xf32>
      %cst_74 = arith.constant 3.200000e+01 : f32
      %250 = vector.broadcast %cst_74 : f32 to vector<16x1xf32>
      %251 = arith.divf %249, %250 : vector<16x1xf32>
      %cst_75 = arith.constant 9.99999974E-6 : f32
      %252 = vector.broadcast %cst_75 : f32 to vector<16x1xf32>
      %253 = arith.addf %251, %252 : vector<16x1xf32>
      %254 = math.rsqrt %253 : vector<16x1xf32>
      %255 = vector.broadcast %254 : vector<16x1xf32> to vector<16x32xf32>
      %256 = arith.mulf %246, %255 : vector<16x32xf32>
      %257 = vector.broadcast %239 : vector<1x32xf32> to vector<16x32xf32>
      %258 = arith.mulf %256, %257 : vector<16x32xf32>
      %259 = vector.broadcast %240 : vector<1x32xf32> to vector<16x32xf32>
      %260 = arith.addf %258, %259 : vector<16x32xf32>
      %c0_76 = arith.constant 0 : index
      %c0_77 = arith.constant 0 : index
      %261 = vector.load %arg7[%c0_76, %c0_77] : memref<32x128xf32, #tpu.memory_space<vmem>>, vector<32x128xf32>
      %cst_78 = arith.constant dense<0.000000e+00> : vector<16x128xf32>
      %262 = tpu.matmul %260, %261, %cst_78 {dimension_numbers = #tpu.dot_dimension_numbers<[1], [0], [0], [1], [0, 0, 1, 1], [], []>} : vector<16x32xf32>, vector<32x128xf32>, vector<16x128xf32> -> vector<16x128xf32>
      %c0_79 = arith.constant 0 : index
      %c0_80 = arith.constant 0 : index
      %263 = vector.load %arg8[%c0_79, %c0_80] : memref<16x128xf32, #tpu.memory_space<vmem>>, vector<16x128xf32>
      tpu.vector_store %arg8[%c0_79, %c0_80], %262 {strides = array<i32>} : memref<16x128xf32, #tpu.memory_space<vmem>>, vector<16x128xf32>,
    } else {
    }
    return
  }
  func.func @transform_0(%arg0: i32) -> (i32, i32) {
    %c0_i32 = arith.constant 0 : i32
    %c0_i32_0 = arith.constant 0 : i32
    %c0_i32_1 = arith.constant 0 : i32
    return %c0_i32, %c0_i32_0 : i32, i32
  }
  func.func @transform_1(%arg0: i32) -> (i32, i32, i32) {
    %c0_i32 = arith.constant 0 : i32
    %c0_i32_0 = arith.constant 0 : i32
    %c0_i32_1 = arith.constant 0 : i32
    return %arg0, %c0_i32, %c0_i32_0 : i32, i32, i32
  }
  func.func @transform_2(%arg0: i32) -> (i32, i32, i32) {
    %c0_i32 = arith.constant 0 : i32
    %c0_i32_0 = arith.constant 0 : i32
    %c0_i32_1 = arith.constant 0 : i32
    return %arg0, %c0_i32, %c0_i32_0 : i32, i32, i32
  }
  func.func @transform_3(%arg0: i32) -> (i32, i32, i32) {
    %c0_i32 = arith.constant 0 : i32
    %c0_i32_0 = arith.constant 0 : i32
    %c0_i32_1 = arith.constant 0 : i32
    return %arg0, %c0_i32, %c0_i32_0 : i32, i32, i32
  }
  func.func @transform_4(%arg0: i32) -> (i32, i32, i32) {
    %c0_i32 = arith.constant 0 : i32
    %c0_i32_0 = arith.constant 0 : i32
    %c0_i32_1 = arith.constant 0 : i32
    return %arg0, %c0_i32, %c0_i32_0 : i32, i32, i32
  }
  func.func @transform_5(%arg0: i32) -> (i32, i32) {
    %c0_i32 = arith.constant 0 : i32
    %c0_i32_0 = arith.constant 0 : i32
    %c0_i32_1 = arith.constant 0 : i32
    return %c0_i32, %c0_i32_0 : i32, i32
  }
  func.func @transform_6(%arg0: i32) -> (i32, i32) {
    %c0_i32 = arith.constant 0 : i32
    %c0_i32_0 = arith.constant 0 : i32
    %c0_i32_1 = arith.constant 0 : i32
    return %c0_i32, %c0_i32_0 : i32, i32
  }
  func.func @transform_7(%arg0: i32) -> (i32, i32) {
    %c0_i32 = arith.constant 0 : i32
    %c0_i32_0 = arith.constant 0 : i32
    %c0_i32_1 = arith.constant 0 : i32
    return %c0_i32, %c0_i32_0 : i32, i32
  }
}

</mosaic_0001>

<bundles_post_ra>
// kernel: gpt_forward.1
= control target key start
LH: loop header
LB: loop body
LE: loop exit
PB: predicated region body
PF: predicated region fallthrough
CT: control target
= control target key end

     0   :  { %12 = vsyncpa [#allocation4], 0  ;;  %s2956_s24 = smov 0   ;;  %s3285_s0 = inlined_call_operand.vmem [shape: f32[16,32], index: 0, kind: input, shape index: {}]   ;;  %s3286_s1 = inlined_call_operand.vmem [shape: f32[2,32,128], index: 1, kind: input, shape index: {}]   ;;  %s3287_s2 = inlined_call_operand.vmem [shape: f32[2,32,128], index: 2, kind: input, shape index: {}]   ;;  %s3288_s3 = inlined_call_operand.vmem [shape: f32[2,128,32], index: 3, kind: input, shape index: {}]   ;;  %s3289_s4 = inlined_call_operand.vmem [shape: f32[2,10,128], index: 4, kind: input, shape index: {}]   ;;  %s3290_s5 = inlined_call_operand.vmem [shape: f32[2,32], index: 5, kind: input, shape index: {}]   ;;  %s3291_s6 = inlined_call_operand.vmem [shape: f32[32,128], index: 6, kind: input, shape index: {}]   ;;  %s3292_s7 = inlined_call_operand.hbm [shape: f32[16,128], index: 7, kind: output, shape index: {}]  }
   0x1 LB: > { %s2962_s25 = sadd.s32 4294967295, %s2894_s24   ;;  %p2418_p0 = scmp.ge.s32.totalorder %s2894_s24, 1  ;;  %s2894_s24 = sphi %s2956_s24, %s18_s24  }
   0x2   : > { %p263_p1 = scmp.lt.s32.totalorder %s2894_s24, 3 }
   0x4   : > { %p264_p2 = pnand %p2418_p0, %p263_p1 }
   0x5   : > { %p305_p3 = scmp.lt.s32.totalorder (!%p264_p2), %s2962_s25, 1  ;;  %p2427_p4 = scmp.ne.s32.totalorder (!%p264_p2), %s2962_s25, 0 }
   0x6   : > { %267 = sbr.rel (%p264_p2) target bundleno = 3153 (0xc51), region = 48 }
   0xd   : > { %s306_s26 = scalar_select %p305_p3, %s2962_s25, 1 }
   0xe   : > { %328 = sbr.rel (%p2427_p4) target bundleno = 21 (0x15), region = 52  ;;  %v329_v0 = vld [vmem:[%s3285_s0] sm:$0xff] (!%p2427_p4)  ;;  %vm331_vm0 = vcmask (!%p2427_p4), 261120   ;;  %v330_v1 = vld [vmem:[%s3285_s0 + $0x8] sm:$0xff] (!%p2427_p4) }
   0xf   : > { %s2465_s27 = sshll.u32 %s306_s26, 5  ;;  %s2467_s28 = sshll.u32 %s306_s26, 7  ;;  %332 = vst.msk [vmem:[#allocation2] sm:$0xff] (!%p2427_p4), %vm331_vm0, %v329_v0  ;;  %333 = vst.msk [vmem:[#allocation2 + $0x8] sm:$0xff] (!%p2427_p4), %vm331_vm0, %v330_v1 }
  0x10   : > { %s2971_s8 = scalar_lea.vmem %s3286_s1, %s2465_s27  ;;  %s2976_s11 = scalar_lea.vmem %s3287_s2, %s2465_s27 }
  0x11   : > { %s2981_s14 = scalar_lea.vmem %s3288_s3, %s2467_s28  ;;  %s2468_s15 = sshll.u32 %s306_s26, 4 }
  0x12   : > { %s2986_s18 = scalar_lea.vmem %s3289_s4, %s2468_s15 }
  0x15 PF: > { %vm338_vm1 = vcmask 261120   ;;  %v3008_v16 = vld [vmem:[%s2971_s8] sm:$0xff]  ;;  %v3011_v17 = vld [vmem:[%s2971_s8 + $0x8] sm:$0xff]  ;;  %v3014_v18 = vld [vmem:[%s2971_s8 + $0x10] sm:$0xff]  ;;  %v366_v23 = vlaneseq  ;;  %s2896_s23 = smov 32   ;;  %v2897_v46 = vmov 0.0  }
  0x16   : > { %v2995_v2 = vld [vmem:[#allocation2] sm:$0xff]  ;;  %v2997_v3 = vld [vmem:[#allocation2 + $0x8] sm:$0xff]  ;;  %v2800_v19 = vpack.i.bf16 %v3011_v17, %v3008_v16  ;;  %v2702_v20 = vpack.c.bf16 %v3011_v17, %v3008_v16  ;;  %v3021_v21 = vld [vmem:[%s2971_s8 + $0x18] sm:$0xff]  ;;  %2564 = vmatprep.subr.mxu0 %v2897_v46  ;;  %vm2898_vm2 = vmmov 0   ;;  %s2899_s26 = smov 80   ;;  %s2900_s27 = smov 96  }
  0x17   : > { %v339_v4 = vsel %vm338_vm1, %v2995_v2, 0.0  ;;  %v342_v5 = vsel %vm338_vm1, %v2997_v3, 0.0  ;;  %v2706_v22 = vpack.c.bf16 %v3021_v21, %v3014_v18  ;;  %v3026_v24 = vshrl.u32 %v366_v23, 7  ;;  %v3030_v26 = vld [vmem:[%s2986_s18] sm:$0xff]  ;;  %2566 = vmatprep.mubr.msk.f32.mxu0 %vm2898_vm2, %v2897_v46  ;;  %s2901_s28 = smov 72   ;;  %s2902_s29 = smov 88  }
  0x18   : > { %340 = vadd.xlane.f32.xlu0 %v339_v4  ;;  %2703 = vmatprep.subr.bf16.mxu1 %v2702_v20  ;;  %s2903_s30 = smov 120   ;;  %s2904_s8 = smov 112   ;;  %vm500_vm3 = vcmask 64512   ;;  %vm1172_vm5 = vcmask 130048   ;;  %vm1174_vm6 = vcmask 195584  }
  0x19   : > { %2705 = vmatpush3.bf16.msra.mxu1 %v2702_v20  ;;  %v473_v25 = vsub.s32 3, %v3026_v24  ;;  %v3035_v34 = vsub.s32 0, %v3026_v24  ;;  %v3038_v35 = vsub.s32 1, %v3026_v24  ;;  %v465_v47 = vsub.s32 2, %v3026_v24  ;;  %s2905_s9 = smov 104   ;;  %s2907_s10 = smov 64  }
  0x1a   : > { %2707 = vmatprep.subr.bf16.mxu1 %v2706_v22  ;;  %s2908_s12 = smov 56   ;;  %s2909_s13 = smov 48  }
  0x1b   : > { %v474_v27 = vrot.slane %v3030_v26, %v473_v25  ;;  %v369_v36 = vrot.slane %v3030_v26, %v3035_v34  ;;  %v375_v39 = vrot.slane %v3030_v26, %v3038_v35  ;;  %v466_v51 = vrot.slane %v3030_v26, %v465_v47  ;;  %s2910_s15 = smov 40   ;;  %s2911_s16 = smov 8  }
  0x1c   : > { %343 = vadd.xlane.f32.xlu0 %v342_v5  ;;  %s2912_s17 = smov 16   ;;  %s2913_s19 = smov 24  }
  0x1d   : > { %2709 = vmatpush3.bf16.msra.mxu1 %v2706_v22  ;;  %p2458_p5 = scmp.ne.s32.totalorder %s2962_s25, 1 }
  0x1e   : > { %2554 = vmatprep.subr.mxu1 %v2897_v46 }
  0x32   : > { %476 = vrot.lane.b32.xlu0 %v474_v27, %s2896_s23 }
  0xa5   : > { %v341_v6 = vpop.xlane.xlu0 %340 }
  0xa6   : > { %v346_v7 = vmul.f32 0.03125, %v341_v6 }
  0xa8   : > { %v348_v8 = vsub.f32 %v2995_v2, %v346_v7 }
  0xa9   : > { %v344_v9 = vpop.xlane.xlu0 %343 }
  0xaa   : > { %v347_v10 = vmul.f32 0.03125, %v344_v9  ;;  %v350_v11 = vmul.f32 %v348_v8, %v348_v8 }
  0xac   : > { %v349_v12 = vsub.f32 %v2997_v3, %v347_v10  ;;  %v352_v13 = vsel %vm338_vm1, %v350_v11, 0.0  ;;  %v494_v10 = vand.u32 127, %v366_v23  ;;  %v2906_v11 = vmov -1e+30  }
  0xad   : > { %353 = vadd.xlane.f32.xlu1 %v352_v13  ;;  %v477_v48 = vpop.permute.xlu0 %476 }
  0xae   : > { %v351_v14 = vmul.f32 %v349_v12, %v349_v12  ;;  %vm495_vm4 = vcmp.ge.s32.totalorder %v3026_v24, %v494_v10 }
  0xb0   : > { %v355_v15 = vsel %vm338_vm1, %v351_v14, 0.0 }
  0xb1   : > { %356 = vadd.xlane.f32.xlu1 %v355_v15 }
 0x13a   : > { %v354_v28 = vpop.xlane.xlu1 %353 }
 0x13b   : > { %v358_v29 = vmul.f32 0.03125, %v354_v28 }
 0x13d   : > { %v360_v30 = vadd.f32 1e-05, %v358_v29 }
 0x13e   : > { %v357_v31 = vpop.xlane.xlu1 %356 }
 0x13f   : > { %2810 = vrsqrt.f32 %v360_v30  ;;  %v359_v32 = vmul.f32 0.03125, %v357_v31 }
 0x141   : > { %v361_v33 = vadd.f32 1e-05, %v359_v32 }
 0x143   : > { %2812 = vrsqrt.f32 %v361_v33 }
 0x149   : > { %v2811_v37 = vpop.eup %2810 }
 0x14a   : > { %v364_v38 = vmul.f32 %v2811_v37, %v348_v8 }
 0x14c   : > { %v370_v40 = vmul.f32 %v369_v36, %v364_v38 }
 0x14d   : > { %v2813_v41 = vpop.eup %2812 }
 0x14e   : > { %v365_v42 = vmul.f32 %v2813_v41, %v349_v12  ;;  %v376_v43 = vadd.f32 %v375_v39, %v370_v40  ;;  %v496_v12 = vsel %vm495_vm4, 0.0, %v2906_v11 }
 0x150   : > { %v371_v44 = vmul.f32 %v369_v36, %v365_v42  ;;  %2551 = vmatprep.mubr.msk.f32.mxu1 %vm338_vm1, %v376_v43 }
 0x152   : > { %v377_v45 = vadd.f32 %v375_v39, %v371_v44 }
 0x154   : > { %2552 = vmatmul.mubr.msk.f32.vlgmr.msra.gmra.mrb[0].mxu1 %vm338_vm1, %v377_v45 }
 0x155   : > { %2556 = vmatprep.mubr.msk.f32.mxu1 %vm2898_vm2, %v2897_v46 }
 0x227   : > { %v3053_v49 = vpop.f32.mrb[0].mxu1 }
 0x228   : > { %v3055_v50 = vpop.f32.mrb[1].mxu1  ;;  %v468_v54 = vadd.f32 %v3053_v49, %v466_v51  ;;  %v480_v55 = vadd.f32 %v3053_v49, %v477_v48 }
 0x229   : > { %v479_v52 = vadd.f32 %v477_v48, %v3055_v50  ;;  %v467_v53 = vadd.f32 %v466_v51, %v3055_v50 }
 0x22a   : > { %v470_v57 = vmul.f32 0.35355338, %v468_v54 }
 0x22b   : > { %831 = vrot.lane.b32.xlu0 %v479_v52, %s2899_s26  ;;  %498 = vrot.lane.b32.xlu1 %v479_v52, %s2900_s27  ;;  %v469_v56 = vmul.f32 0.35355338, %v467_v53 }
 0x22f   : > { %996 = vrot.lane.b32.xlu0 %v479_v52, %s2901_s28  ;;  %666 = vrot.lane.b32.xlu1 %v479_v52, %s2902_s29 }
 0x233   : > { %1177 = vrot.lane.b32.xlu0 %v480_v55, %s2900_s27  ;;  %664 = vrot.lane.b32.xlu1 %v469_v56, %s2903_s30 }
 0x237   : > { %1342 = vrot.lane.b32.xlu0 %v470_v57, %s2903_s30  ;;  %829 = vrot.lane.b32.xlu1 %v469_v56, %s2904_s8 }
 0x23b   : > { %1507 = vrot.lane.b32.xlu0 %v470_v57, %s2904_s8  ;;  %994 = vrot.lane.b32.xlu1 %v469_v56, %s2905_s9 }
 0x23f   : > { %1672 = vrot.lane.b32.xlu0 %v470_v57, %s2905_s9  ;;  %1344 = vrot.lane.b32.xlu1 %v480_v55, %s2902_s29 }
 0x243   : > { %1509 = vrot.lane.b32.xlu1 %v480_v55, %s2899_s26 }
 0x247   : > { %1674 = vrot.lane.b32.xlu1 %v480_v55, %s2901_s28 }
 0x29d   : > { %v499_v58 = vpop.permute.xlu1 %498  ;;  %v832_v59 = vpop.permute.xlu0 %831 }
 0x29e   : > { %2555 = vmatpush3.xpose.msk.msra.mxu1 %vm500_vm3, %v499_v58 }
 0x29f   : > { %2559 = vmatprep.subr.mxu1 %v2897_v46 }
 0x2a1   : > { %2557 = vmatmul.mubr.msk.f32.vlgmr.msra.gmra.mrb[2].mxu1 %vm500_vm3, %v469_v56  ;;  %v667_v60 = vpop.permute.xlu1 %666  ;;  %v997_v61 = vpop.permute.xlu0 %996 }
 0x2a2   : > { %2565 = vmatpush3.xpose.msk.msra.mxu0 %vm500_vm3, %v667_v60  ;;  %2561 = vmatprep.mubr.msk.f32.mxu1 %vm2898_vm2, %v2897_v46 }
 0x2a3   : > { %2574 = vmatprep.subr.mxu0 %v2897_v46 }
 0x2a5   : > { %v665_v62 = vpop.permute.xlu1 %664  ;;  %v1178_v0 = vpop.permute.xlu0 %1177 }
 0x2a6   : > { %2567 = vmatmul.mubr.msk.f32.vlgmr.msra.gmra.mrb[0].mxu0 %vm500_vm3, %v665_v62 }
 0x2a7   : > { %2575 = vmatpush3.xpose.msk.msra.mxu0 %vm500_vm3, %v832_v59  ;;  %2576 = vmatprep.mubr.msk.f32.mxu0 %vm2898_vm2, %v2897_v46 }
 0x2a8   : > { %2584 = vmatprep.subr.mxu0 %v2897_v46 }
 0x2a9   : > { %v830_v63 = vpop.permute.xlu1 %829  ;;  %v1343_v4 = vpop.permute.xlu0 %1342 }
 0x2aa   : > { %2577 = vmatmul.mubr.msk.f32.vlgmr.msra.gmra.mrb[2].mxu0 %vm500_vm3, %v830_v63 }
 0x2ab   : > { %2585 = vmatpush3.xpose.msk.msra.mxu0 %vm500_vm3, %v997_v61  ;;  %2586 = vmatprep.mubr.msk.f32.mxu0 %vm2898_vm2, %v2897_v46 }
 0x2ac   : > { %2594 = vmatprep.subr.mxu0 %v2897_v46 }
 0x2ad   : > { %v995_v1 = vpop.permute.xlu1 %994  ;;  %v1508_v7 = vpop.permute.xlu0 %1507 }
 0x2ae   : > { %2587 = vmatmul.mubr.msk.f32.vlgmr.msra.gmra.mrb[4].mxu0 %vm500_vm3, %v995_v1 }
 0x2af   : > { %2595 = vmatpush3.xpose.msk.msra.mxu0 %vm500_vm3, %v1178_v0  ;;  %2596 = vmatprep.mubr.msk.f32.mxu0 %vm2898_vm2, %v2897_v46 }
 0x2b0   : > { %2604 = vmatprep.subr.mxu0 %v2897_v46 }
 0x2b1   : > { %v1345_v5 = vpop.permute.xlu1 %1344  ;;  %v1673_v9 = vpop.permute.xlu0 %1672 }
 0x2b2   : > { %2597 = vmatmul.mubr.msk.f32.vlgmr.msra.gmra.mrb[6].mxu0 %vm500_vm3, %v470_v57  ;;  %v483_v57 = vsub.s32 4, %v3026_v24 }
 0x2b3   : > { %2605 = vmatpush3.xpose.msk.msra.mxu0 %vm500_vm3, %v1345_v5  ;;  %2606 = vmatprep.mubr.msk.f32.mxu0 %vm2898_vm2, %v2897_v46 }
 0x2b4   : > { %2614 = vmatprep.subr.mxu0 %v2897_v46  ;;  %v484_v58 = vrot.slane %v3030_v26, %v483_v57 }
 0x2b5   : > { %v1510_v6 = vpop.permute.xlu1 %1509 }
 0x2b6   : > { %2607 = vmatmul.mubr.msk.f32.vlgmr.msra.gmra.mrb[8].mxu0 %vm500_vm3, %v1343_v4 }
 0x2b7   : > { %2615 = vmatpush3.xpose.msk.msra.mxu0 %vm500_vm3, %v1510_v6  ;;  %2616 = vmatprep.mubr.msk.f32.mxu0 %vm2898_vm2, %v2897_v46 }
 0x2b8   : > { %2624 = vmatprep.subr.mxu0 %v2897_v46 }
 0x2b9   : > { %v1675_v8 = vpop.permute.xlu1 %1674 }
 0x2ba   : > { %2617 = vmatmul.mubr.msk.f32.vlgmr.msra.gmra.mrb[10].mxu0 %vm500_vm3, %v1508_v7 }
 0x2bb   : > { %2625 = vmatpush3.xpose.msk.msra.mxu0 %vm500_vm3, %v1675_v8  ;;  %2626 = vmatprep.mubr.msk.f32.mxu0 %vm2898_vm2, %v2897_v46 }
 0x2be   : > { %2627 = vmatmul.mubr.msk.f32.vlgmr.msra.gmra.mrb[12].mxu0 %vm500_vm3, %v1673_v9 }
 0x374   : > { %v572_v13 = vpop.f32.mrb[2].mxu1 }
 0x375   : > { %v573_v14 = vadd.f32 %v572_v13, %v496_v12  ;;  %v2558_v15 = vpop.f32.mrb[3].mxu1 }
 0x377   : > { %v576_v20 = vsel %vm500_vm3, %v573_v14, -inf }
 0x378   : > { %577 = vmax.xlane.f32.xlu1 %v576_v20 }
 0x379   : > { %v738_v22 = vpop.f32.mrb[0].mxu0 }
 0x37a   : > { %v739_v25 = vadd.f32 %v738_v22, %v496_v12  ;;  %v2568_v27 = vpop.f32.mrb[1].mxu0 }
 0x37c   : > { %v742_v28 = vsel %vm500_vm3, %v739_v25, -inf }
 0x37d   : > { %743 = vmax.xlane.f32.xlu0 %v742_v28  ;;  %v903_v29 = vpop.f32.mrb[2].mxu0 }
 0x37e   : > { %v904_v30 = vadd.f32 %v903_v29, %v496_v12  ;;  %v2578_v31 = vpop.f32.mrb[3].mxu0 }
 0x380   : > { %v907_v23 = vsel %vm500_vm3, %v904_v30, -inf }
 0x381   : > { %908 = vmax.xlane.f32.xlu0 %v907_v23  ;;  %v1068_v32 = vpop.f32.mrb[4].mxu0 }
 0x382   : > { %v1069_v33 = vadd.f32 %v1068_v32, %v496_v12  ;;  %v2588_v36 = vpop.f32.mrb[5].mxu0 }
 0x384   : > { %v1072_v37 = vsel %vm500_vm3, %v1069_v33, -inf }
 0x385   : > { %1073 = vmax.xlane.f32.xlu0 %v1072_v37  ;;  %v1250_v38 = vpop.f32.mrb[6].mxu0 }
 0x386   : > { %v1251_v39 = vadd.f32 %v1250_v38, %v496_v12  ;;  %v2598_v40 = vpop.f32.mrb[7].mxu0 }
 0x388   : > { %v1254_v41 = vsel %vm500_vm3, %v1251_v39, -inf }
 0x389   : > { %1255 = vmax.xlane.f32.xlu1 %v1254_v41  ;;  %v1416_v42 = vpop.f32.mrb[8].mxu0 }
 0x38a   : > { %v1417_v43 = vadd.f32 %v1416_v42, %v496_v12  ;;  %v2608_v44 = vpop.f32.mrb[9].mxu0 }
 0x38c   : > { %v1420_v45 = vsel %vm500_vm3, %v1417_v43, -inf }
 0x38d   : > { %1421 = vmax.xlane.f32.xlu0 %v1420_v45  ;;  %v1581_v47 = vpop.f32.mrb[10].mxu0 }
 0x38e   : > { %v1582_v48 = vadd.f32 %v1581_v47, %v496_v12  ;;  %v2618_v51 = vpop.f32.mrb[11].mxu0 }
 0x390   : > { %v1585_v52 = vsel %vm500_vm3, %v1582_v48, -inf }
 0x391   : > { %1586 = vmax.xlane.f32.xlu1 %v1585_v52  ;;  %v1746_v53 = vpop.f32.mrb[12].mxu0 }
 0x392   : > { %v1747_v54 = vadd.f32 %v1746_v53, %v496_v12  ;;  %v2628_v55 = vpop.f32.mrb[13].mxu0 }
 0x394   : > { %v1750_v56 = vsel %vm500_vm3, %v1747_v54, -inf }
 0x395   : > { %1751 = vmax.xlane.f32.xlu0 %v1750_v56 }
 0x3a2   : > { %486 = vrot.lane.b32.xlu1 %v484_v58, %s2907_s10 }
 0x405   : > { %v578_v59 = vpop.xlane.xlu1 %577 }
 0x406   : > { %v579_v1 = vsub.f32 %v573_v14, %v578_v59 }
 0x408   : > { %v580_v6 = vmul.f32 1.442695, %v579_v1 }
 0x40a   : > { %v744_v0 = vpop.xlane.xlu0 %743  ;;  %2814 = vpow2.f32 %v580_v6 }
 0x40b   : > { %v745_v7 = vsub.f32 %v739_v25, %v744_v0 }
 0x40e   : > { %v909_v5 = vpop.xlane.xlu0 %908 }
 0x40f   : > { %v910_v8 = vsub.f32 %v904_v30, %v909_v5 }
 0x411   : > { %v911_v10 = vmul.f32 1.442695, %v910_v8 }
 0x412   : > { %v1074_v9 = vpop.xlane.xlu0 %1073 }
 0x413   : > { %v1075_v11 = vsub.f32 %v1069_v33, %v1074_v9 }
 0x414   : > { %v2815_v22 = vpop.eup %2814 }
 0x415   : > { %v1076_v13 = vmul.f32 1.442695, %v1075_v11  ;;  %v582_v25 = vsel %vm500_vm3, %v2815_v22, 0.0 }
 0x416   : > { %v1256_v60 = vpop.xlane.xlu1 %1255 }
 0x417   : > { %v1257_v20 = vsub.f32 %v1251_v39, %v1256_v60 }
 0x419   : > { %v1258_v27 = vmul.f32 1.442695, %v1257_v20 }
 0x41a   : > { %v1422_v12 = vpop.xlane.xlu0 %1421 }
 0x41b   : > { %v1423_v15 = vsub.f32 %v1417_v43, %v1422_v12 }
 0x41d   : > { %v1424_v14 = vmul.f32 1.442695, %v1423_v15 }
 0x41e   : > { %v1587_v61 = vpop.xlane.xlu1 %1586 }
 0x422   : > { %v487_v62 = vpop.permute.xlu1 %486  ;;  %v1752_v28 = vpop.xlane.xlu0 %1751 }
 0x423   : > { %v489_v63 = vadd.f32 %v487_v62, %v3055_v50  ;;  %v490_v4 = vadd.f32 %v3053_v49, %v487_v62  ;;  %v746_v50 = vmul.f32 1.442695, %v745_v7  ;;  %v1588_v49 = vsub.f32 %v1582_v48, %v1587_v61 }
 0x424   : > { %v1753_v31 = vsub.f32 %v1747_v54, %v1752_v28 }
 0x425   : > { %753 = vrot.lane.b32.xlu1 %v489_v63, %s2908_s12  ;;  %588 = vrot.lane.b32.xlu0 %v489_v63, %s2907_s10  ;;  %2816 = vpow2.f32 %v746_v50  ;;  %v1589_v30 = vmul.f32 1.442695, %v1588_v49 }
 0x426   : > { %2818 = vpow2.f32 %v911_v10  ;;  %v1754_v33 = vmul.f32 1.442695, %v1753_v31 }
 0x427   : > { %2820 = vpow2.f32 %v1076_v13 }
 0x428   : > { %2822 = vpow2.f32 %v1424_v14 }
 0x429   : > { %918 = vrot.lane.b32.xlu1 %v489_v63, %s2909_s13  ;;  %2824 = vpow2.f32 %v1258_v27 }
 0x42a   : > { %2826 = vpow2.f32 %v1589_v30 }
 0x42b   : > { %2828 = vpow2.f32 %v1754_v33 }
 0x42d   : > { %1083 = vrot.lane.b32.xlu1 %v489_v63, %s2910_s15 }
 0x42f   : > { %v2817_v29 = vpop.eup %2816 }
 0x430   : > { %v748_v23 = vsel %vm500_vm3, %v2817_v29, 0.0  ;;  %v2819_v32 = vpop.eup %2818 }
 0x431   : > { %1266 = vrot.lane.b32.xlu1 %v490_v4, %s2907_s10  ;;  %v913_v36 = vsel %vm500_vm3, %v2819_v32, 0.0  ;;  %v2821_v37 = vpop.eup %2820 }
 0x432   : > { %v1078_v38 = vsel %vm500_vm3, %v2821_v37, 0.0  ;;  %v3120_v39 = vpop.eup %2822 }
 0x433   : > { %v3122_v40 = vpop.eup %2824  ;;  %v1426_v41 = vsel %vm500_vm3, %v3120_v39, 0.0 }
 0x434   : > { %v3126_v42 = vpop.eup %2826  ;;  %v1260_v43 = vsel %vm500_vm3, %v3122_v40, 0.0 }
 0x435   : > { %v1591_v44 = vsel %vm500_vm3, %v3126_v42, 0.0  ;;  %v3132_v45 = vpop.eup %2828 }
 0x436   : > { %v1756_v47 = vsel %vm500_vm3, %v3132_v45, 0.0 }
 0x444   : > { %583 = vadd.xlane.f32.xlu0 %v582_v25 }
 0x448   : > { %749 = vadd.xlane.f32.xlu0 %v748_v23 }
 0x44c   : > { %914 = vadd.xlane.f32.xlu0 %v913_v36 }
 0x450   : > { %1079 = vadd.xlane.f32.xlu0 %v1078_v38 }
 0x454   : > { %1427 = vadd.xlane.f32.xlu0 %v1426_v41 }
 0x455   : > { %1261 = vadd.xlane.f32.xlu1 %v1260_v43 }
 0x458   : > { %1592 = vadd.xlane.f32.xlu0 %v1591_v44 }
 0x45c   : > { %1757 = vadd.xlane.f32.xlu0 %v1756_v47 }
 0x466   : > { %1596 = vrot.lane.b32.xlu1 %v490_v4, %s2909_s13 }
 0x46a   : > { %1761 = vrot.lane.b32.xlu1 %v490_v4, %s2910_s15 }
 0x46e   : > { %2801 = vrot.lane.b32.xlu1 %v2800_v19, %s2896_s23 }
 0x472   : > { %1431 = vrot.lane.b32.xlu0 %v490_v4, %s2908_s12 }
 0x497   : > { %v589_v48 = vpop.permute.xlu0 %588  ;;  %v754_v51 = vpop.permute.xlu1 %753 }
 0x498   : > { %2560 = vmatpush3.msra.mxu1 %v589_v48 }
 0x499   : > { %2569 = vmatprep.subr.mxu1 %v2897_v46 }
 0x49b   : > { %v919_v53 = vpop.permute.xlu1 %918 }
 0x49f   : > { %v1084_v55 = vpop.permute.xlu1 %1083 }
 0x4a3   : > { %v1267_v16 = vpop.permute.xlu1 %1266 }
 0x4d1   : > { %v584_v52 = vpop.xlane.xlu0 %583 }
 0x4d2   : > { %2830 = vrcp.f32 %v584_v52 }
 0x4d5   : > { %v750_v54 = vpop.xlane.xlu0 %749 }
 0x4d6   : > { %2832 = vrcp.f32 %v750_v54 }
 0x4d9   : > { %v915_v56 = vpop.xlane.xlu0 %914 }
 0x4da   : > { %2834 = vrcp.f32 %v915_v56 }
 0x4dc   : > { %v2831_v57 = vpop.eup %2830 }
 0x4dd   : > { %v586_v58 = vmul.f32 %v2831_v57, %v2815_v22  ;;  %v1080_v59 = vpop.xlane.xlu0 %1079  ;;  %v2805_v22 = vpack.i.bf16 %v3021_v21, %v3014_v18 }
 0x4de   : > { %2836 = vrcp.f32 %v1080_v59 }
 0x4df   : > { %2562 = vmatmul.mubr.msk.f32.vlgmr.msra.gmra.mrb[4].mxu1 %vm500_vm3, %v586_v58  ;;  %2806 = vrot.lane.b32.xlu1 %v2805_v22, %s2896_s23  ;;  %v1995_v22 = vld [vmem:[%s2976_s11 + $0x10] sm:$0xff] }
 0x4e0   : > { %v2833_v17 = vpop.eup %2832  ;;  %2570 = vmatpush3.msra.mxu1 %v754_v51  ;;  %2571 = vmatprep.mubr.msk.f32.mxu1 %vm2898_vm2, %v2897_v46 }
 0x4e1   : > { %v752_v19 = vmul.f32 %v2833_v17, %v2817_v29  ;;  %v1428_v60 = vpop.xlane.xlu0 %1427  ;;  %2579 = vmatprep.subr.mxu1 %v2897_v46  ;;  %v1854_v17 = vsub.s32 5, %v3026_v24 }
 0x4e2   : > { %v1262_v61 = vpop.xlane.xlu1 %1261 }
 0x4e3   : > { %2838 = vrcp.f32 %v1262_v61  ;;  %2572 = vmatmul.mubr.msk.f32.vlgmr.msra.gmra.mrb[6].mxu1 %vm500_vm3, %v752_v19  ;;  %v1855_v19 = vrot.slane %v3030_v26, %v1854_v17  ;;  %v2112_v17 = vld [vmem:[%s2981_s14 + $0x60] sm:$0xff] }
 0x4e4   : > { %v2835_v62 = vpop.eup %2834  ;;  %2580 = vmatpush3.msra.mxu1 %v919_v53  ;;  %2581 = vmatprep.mubr.msk.f32.mxu1 %vm2898_vm2, %v2897_v46  ;;  %2840 = vrcp.f32 %v1428_v60 }
 0x4e5   : > { %v917_v63 = vmul.f32 %v2835_v62, %v2819_v32  ;;  %v1593_v0 = vpop.xlane.xlu0 %1592  ;;  %2589 = vmatprep.subr.mxu1 %v2897_v46 }
 0x4e6   : > { %2842 = vrcp.f32 %v1593_v0  ;;  %v1597_v10 = vpop.permute.xlu1 %1596 }
 0x4e7   : > { %2582 = vmatmul.mubr.msk.f32.vlgmr.msra.gmra.mrb[8].mxu1 %vm500_vm3, %v917_v63 }
 0x4e8   : > { %v2837_v1 = vpop.eup %2836  ;;  %2590 = vmatpush3.msra.mxu1 %v1084_v55  ;;  %2591 = vmatprep.mubr.msk.f32.mxu1 %vm2898_vm2, %v2897_v46 }
 0x4e9   : > { %v1082_v4 = vmul.f32 %v2837_v1, %v2821_v37  ;;  %2599 = vmatprep.subr.mxu1 %v2897_v46  ;;  %v1758_v5 = vpop.xlane.xlu0 %1757 }
 0x4ea   : > { %2844 = vrcp.f32 %v1758_v5  ;;  %v1762_v15 = vpop.permute.xlu1 %1761 }
 0x4eb   : > { %2592 = vmatmul.mubr.msk.f32.vlgmr.msra.gmra.mrb[10].mxu1 %vm500_vm3, %v1082_v4 }
 0x4ec   : > { %2600 = vmatpush3.msra.mxu1 %v1267_v16  ;;  %2601 = vmatprep.mubr.msk.f32.mxu1 %vm2898_vm2, %v2897_v46 }
 0x4ed   : > { %v2839_v6 = vpop.eup %2838  ;;  %2609 = vmatprep.subr.mxu1 %v2897_v46  ;;  %v1432_v8 = vpop.permute.xlu0 %1431 }
 0x4ee   : > { %v1264_v7 = vmul.f32 %v2839_v6, %v3122_v40  ;;  %v2841_v50 = vpop.eup %2840  ;;  %v2802_v14 = vpop.permute.xlu1 %2801 }
 0x4ef   : > { %v1430_v9 = vmul.f32 %v2841_v50, %v3120_v39  ;;  %v2804_v49 = vunpack.i.h.bf16 %v2802_v14  ;;  %v2803_v27 = vunpack.i.l.bf16 %v2802_v14  ;;  %v1996_v14 = vld [vmem:[%s2976_s11 + $0x18] sm:$0xff] }
 0x4f0   : > { %2602 = vmatmul.mubr.msk.f32.vlgmr.msra.gmra.mrb[12].mxu1 %vm500_vm3, %v1264_v7  ;;  %v2843_v11 = vpop.eup %2842 }
 0x4f1   : > { %2610 = vmatpush3.msra.mxu1 %v1432_v8  ;;  %2611 = vmatprep.mubr.msk.f32.mxu1 %vm2898_vm2, %v2897_v46  ;;  %v1595_v12 = vmul.f32 %v2843_v11, %v3126_v42  ;;  %v2710_v28 = vpack.c.bf16 %v2804_v49, %v2803_v27  ;;  %v2722_v49 = vpack.c.bf16 %v1996_v14, %v1995_v22  ;;  %v2100_v27 = vld [vmem:[%s2981_s14] sm:$0xff] }
 0x4f2   : > { %2619 = vmatprep.subr.mxu1 %v2897_v46 }
 0x4f4   : > { %2612 = vmatmul.mubr.msk.f32.vlgmr.msra.gmra.mrb[14].mxu1 %vm500_vm3, %v1430_v9  ;;  %v2845_v13 = vpop.eup %2844 }
 0x4f5   : > { %2620 = vmatpush3.msra.mxu1 %v1597_v10  ;;  %2621 = vmatprep.mubr.msk.f32.mxu1 %vm2898_vm2, %v2897_v46  ;;  %v1760_v20 = vmul.f32 %v2845_v13, %v3132_v45  ;;  %v1993_v13 = vld [vmem:[%s2976_s11] sm:$0xff] }
 0x4f6   : > { %2629 = vmatprep.subr.mxu1 %v2897_v46 }
 0x4f8   : > { %2622 = vmatmul.mubr.msk.f32.vlgmr.msra.gmra.mrb[16].mxu1 %vm500_vm3, %v1595_v12 }
 0x4f9   : > { %2630 = vmatpush3.msra.mxu1 %v1762_v15  ;;  %2631 = vmatprep.mubr.msk.f32.mxu1 %vm2898_vm2, %v2897_v46  ;;  %v1994_v15 = vld [vmem:[%s2976_s11 + $0x8] sm:$0xff] }
 0x4fa   : > { %2711 = vmatprep.subr.bf16.mxu1 %v2710_v28 }
 0x4fc   : > { %2632 = vmatmul.mubr.msk.f32.vlgmr.msra.gmra.mrb[18].mxu1 %vm500_vm3, %v1760_v20  ;;  %v2718_v20 = vpack.c.bf16 %v1994_v15, %v1993_v13 }
 0x4fd   : > { %2713 = vmatpush3.bf16.msra.mxu1 %v2710_v28  ;;  %v2101_v28 = vld [vmem:[%s2981_s14 + $0x8] sm:$0xff] }
 0x551   : > { %v2807_v25 = vpop.permute.xlu1 %2806 }
 0x552   : > { %v2809_v29 = vunpack.i.h.bf16 %v2807_v25  ;;  %v2808_v30 = vunpack.i.l.bf16 %v2807_v25  ;;  %v2726_v25 = vpack.c.bf16 %v2101_v28, %v2100_v27 }
 0x554   : > { %v2714_v31 = vpack.c.bf16 %v2809_v29, %v2808_v30  ;;  %2727 = vmatprep.subr.bf16.mxu0 %v2726_v25 }
 0x555   : > { %2729 = vmatpush3.bf16.msra.mxu0 %v2726_v25 }
 0x556   : > { %2715 = vmatprep.subr.bf16.mxu1 %v2714_v31 }
 0x557   : > { %2717 = vmatpush3.bf16.msra.mxu1 %v2714_v31 }
 0x558   : > { %2719 = vmatprep.subr.bf16.mxu1 %v2718_v20 }
 0x5b2   : > { %v660_v46 = vpop.f32.mrb[4].mxu1 }
 0x5b3   : > { %v2563_v23 = vpop.f32.mrb[5].mxu1 }
 0x5b6   : > { %v825_v32 = vpop.f32.mrb[6].mxu1 }
 0x5b7   : > { %1160 = vrot.lane.b32.xlu1 %v825_v32, %s2911_s16  ;;  %v2573_v18 = vpop.f32.mrb[7].mxu1 }
 0x5b8   : > { %v1983_v18 = vsub.s32 6, %v3026_v24 }
 0x5ba   : > { %v990_v21 = vpop.f32.mrb[8].mxu1 }
 0x5bb   : > { %1164 = vrot.lane.b32.xlu1 %v990_v21, %s2912_s17  ;;  %v2583_v33 = vpop.f32.mrb[9].mxu1  ;;  %v1989_v21 = vsub.s32 7, %v3026_v24  ;;  %v2102_v24 = vld [vmem:[%s2981_s14 + $0x10] sm:$0xff] }
 0x5bc   : > { %v1984_v33 = vrot.slane %v3030_v26, %v1983_v18 }
 0x5be   : > { %v1155_v36 = vpop.f32.mrb[10].mxu1 }
 0x5bf   : > { %1168 = vrot.lane.b32.xlu1 %v1155_v36, %s2913_s19  ;;  %v2593_v37 = vpop.f32.mrb[11].mxu1 }
 0x5c3   : > { %v1338_v38 = vpop.f32.mrb[12].mxu1 }
 0x5c4   : > { %v2603_v39 = vpop.f32.mrb[13].mxu1 }
 0x5c7   : > { %v1503_v40 = vpop.f32.mrb[14].mxu1 }
 0x5c8   : > { %1838 = vrot.lane.b32.xlu0 %v1503_v40, %s2911_s16  ;;  %v2613_v41 = vpop.f32.mrb[15].mxu1 }
 0x5cb   : > { %v1668_v42 = vpop.f32.mrb[16].mxu1 }
 0x5cc   : > { %1842 = vrot.lane.b32.xlu0 %v1668_v42, %s2912_s17  ;;  %v2623_v43 = vpop.f32.mrb[17].mxu1 }
 0x5cf   : > { %v1833_v44 = vpop.f32.mrb[18].mxu1 }
 0x5d0   : > { %1846 = vrot.lane.b32.xlu1 %v1833_v44, %s2913_s19  ;;  %v2633_v45 = vpop.f32.mrb[19].mxu1 }
 0x5d1   : > { %v2103_v45 = vld [vmem:[%s2981_s14 + $0x18] sm:$0xff] }
 0x629   : > { %v1161_v47 = vpop.permute.xlu1 %1160 }
 0x62a   : > { %v1171_v51 = vsel %vm500_vm3, %v660_v46, %v1161_v47  ;;  %v2730_v47 = vpack.c.bf16 %v2103_v45, %v2102_v24 }
 0x62c   : > { %2731 = vmatprep.subr.bf16.mxu0 %v2730_v47 }
 0x62d   : > { %v1165_v48 = vpop.permute.xlu1 %1164  ;;  %2733 = vmatpush3.bf16.msra.mxu0 %v2730_v47  ;;  %v2244_v47 = vld [vmem:[%s3291_s6] sm:$0xff] (!%p2458_p5) }
 0x62e   : > { %v1173_v52 = vsel %vm1172_vm5, %v1171_v51, %v1165_v48  ;;  %v2105_v48 = vld [vmem:[%s2981_s14 + $0x28] sm:$0xff] }
 0x631   : > { %v1169_v53 = vpop.permute.xlu1 %1168 }
 0x632   : > { %v1175_v54 = vsel %vm1174_vm6, %v1173_v52, %v1169_v53  ;;  %v2106_v52 = vld [vmem:[%s2981_s14 + $0x30] sm:$0xff]  ;;  %v2107_v53 = vld [vmem:[%s2981_s14 + $0x38] sm:$0xff] }
 0x633   : > { %2642 = vmatprep.mubr.msk.f32.mxu1 %vm338_vm1, %v1175_v54  ;;  %v2738_v54 = vpack.c.bf16 %v2107_v53, %v2106_v52  ;;  %v2247_v52 = vld [vmem:[%s3291_s6 + $0x18] sm:$0xff] (!%p2458_p5) }
 0x63a   : > { %v1839_v55 = vpop.permute.xlu0 %1838 }
 0x63b   : > { %v1849_v57 = vsel %vm500_vm3, %v1338_v38, %v1839_v55  ;;  %v1990_v38 = vrot.slane %v3030_v26, %v1989_v21  ;;  %v2104_v26 = vld [vmem:[%s2981_s14 + $0x20] sm:$0xff] }
 0x63c   : > { %v2734_v51 = vpack.c.bf16 %v2105_v48, %v2104_v26  ;;  %v2108_v55 = vld [vmem:[%s2981_s14 + $0x40] sm:$0xff]  ;;  %v2245_v26 = vld [vmem:[%s3291_s6 + $0x8] sm:$0xff] (!%p2458_p5)  ;;  %v2246_v48 = vld [vmem:[%s3291_s6 + $0x10] sm:$0xff] (!%p2458_p5) }
 0x63d   : > { %v2762_v53 = vpack.c.bf16 (!%p2458_p5), %v2247_v52, %v2246_v48 }
 0x63e   : > { %v1843_v56 = vpop.permute.xlu0 %1842  ;;  %2735 = vmatprep.subr.bf16.mxu0 %v2734_v51 }
 0x63f   : > { %v1850_v58 = vsel %vm1172_vm5, %v1849_v57, %v1843_v56  ;;  %2737 = vmatpush3.bf16.msra.mxu0 %v2734_v51  ;;  %v2109_v56 = vld [vmem:[%s2981_s14 + $0x48] sm:$0xff]  ;;  %v2758_v51 = vpack.c.bf16 (!%p2458_p5), %v2245_v26, %v2244_v47 }
 0x640   : > { %v2742_v57 = vpack.c.bf16 %v2109_v56, %v2108_v55  ;;  %2739 = vmatprep.subr.bf16.mxu0 %v2738_v54 }
 0x642   : > { %v1847_v59 = vpop.permute.xlu1 %1846 }
 0x643   : > { %v1851_v16 = vsel %vm1174_vm6, %v1850_v58, %v1847_v59  ;;  %v2110_v58 = vld [vmem:[%s2981_s14 + $0x50] sm:$0xff]  ;;  %v2111_v59 = vld [vmem:[%s2981_s14 + $0x58] sm:$0xff]  ;;  %2741 = vmatpush3.bf16.msra.mxu0 %v2738_v54 }
 0x644   : > { %2643 = vmatmul.mubr.msk.f32.vlgmr.msra.gmra.mrb[20].mxu1 %vm338_vm1, %v1851_v16  ;;  %2743 = vmatprep.subr.bf16.mxu0 %v2742_v57  ;;  %v2746_v16 = vpack.c.bf16 %v2111_v59, %v2110_v58 }
 0x645   : > { %2721 = vmatpush3.bf16.msra.mxu1 %v2718_v20 }
 0x646   : > { %2723 = vmatprep.subr.bf16.mxu1 %v2722_v49 }
 0x647   : > { %2745 = vmatpush3.bf16.msra.mxu0 %v2742_v57 }
 0x648   : > { %2747 = vmatprep.subr.bf16.mxu0 %v2746_v16 }
 0x649   : > { %2725 = vmatpush3.bf16.msra.mxu1 %v2722_v49 }
 0x64b   : > { %2749 = vmatpush3.bf16.msra.mxu0 %v2746_v16  ;;  %v2205_v16 = vld [vmem:[%s3290_s5] sm:$0x3] (!%p2458_p5) }
 0x717   : > { %v2644_v60 = vpop.f32.mrb[20].mxu1 }
 0x718   : > { %v1950_v61 = vadd.f32 %v2644_v60, %v1855_v19  ;;  %v1944_v62 = vpop.f32.mrb[21].mxu1 }
 0x719   : > { %v1945_v63 = vadd.f32 %v1944_v62, %v1855_v19  ;;  %v2113_v19 = vld [vmem:[%s2981_s14 + $0x68] sm:$0xff]  ;;  %v2115_v62 = vld [vmem:[%s2981_s14 + $0x78] sm:$0xff] }
 0x71a   : > { %v3188_v0 = vadd.f32 %v1950_v61, %v2997_v3  ;;  %v2750_v60 = vpack.c.bf16 %v2113_v19, %v2112_v17  ;;  %v2114_v61 = vld [vmem:[%s2981_s14 + $0x70] sm:$0xff]  ;;  %v2235_v17 = vrot.slane (!%p2458_p5), %v2205_v16, %v3035_v34 }
 0x71b   : > { %v3191_v1 = vadd.f32 %v1945_v63, %v2995_v2  ;;  %v2754_v63 = vpack.c.bf16 %v2115_v62, %v2114_v61  ;;  %v2241_v61 = vrot.slane (!%p2458_p5), %v2205_v16, %v3038_v35 }
 0x71c   : > { %v1958_v4 = vsel %vm338_vm1, %v3188_v0, 0.0  ;;  %2751 = vmatprep.subr.bf16.mxu0 %v2750_v60 }
 0x71d   : > { %1959 = vadd.xlane.f32.xlu1 %v1958_v4  ;;  %v1955_v5 = vsel %vm338_vm1, %v3191_v1, 0.0  ;;  %2753 = vmatpush3.bf16.msra.mxu0 %v2750_v60  ;;  %v337_v4 = vld [vmem:[%s2986_s18 + $0x8] sm:$0x3] }
 0x71e   : > { %1956 = vadd.xlane.f32.xlu0 %v1955_v5  ;;  %2755 = vmatprep.subr.bf16.mxu0 %v2754_v63  ;;  %v2000_v5 = vrot.slane %v337_v4, %v3035_v34 }
 0x721   : > { %2757 = vmatpush3.bf16.msra.mxu0 %v2754_v63 }
 0x722   : > { %2759 = vmatprep.subr.bf16.mxu0 (!%p2458_p5), %v2758_v51 }
 0x7aa   : > { %v1960_v6 = vpop.xlane.xlu1 %1959 }
 0x7ab   : > { %v1962_v7 = vmul.f32 0.03125, %v1960_v6  ;;  %v1957_v50 = vpop.xlane.xlu0 %1956 }
 0x7ac   : > { %v1961_v3 = vmul.f32 0.03125, %v1957_v50 }
 0x7ad   : > { %v1964_v8 = vsub.f32 %v3188_v0, %v1962_v7 }
 0x7ae   : > { %v1963_v2 = vsub.f32 %v3191_v1, %v1961_v3 }
 0x7af   : > { %v1966_v11 = vmul.f32 %v1964_v8, %v1964_v8 }
 0x7b0   : > { %v1965_v9 = vmul.f32 %v1963_v2, %v1963_v2 }
 0x7b1   : > { %v1970_v12 = vsel %vm338_vm1, %v1966_v11, 0.0 }
 0x7b2   : > { %v1967_v10 = vsel %vm338_vm1, %v1965_v9, 0.0 }
 0x7b3   : > { %1968 = vadd.xlane.f32.xlu0 %v1967_v10 }
 0x7b7   : > { %1971 = vadd.xlane.f32.xlu0 %v1970_v12 }
 0x840   : > { %v1969_v29 = vpop.xlane.xlu0 %1968 }
 0x841   : > { %v1973_v30 = vmul.f32 0.03125, %v1969_v29 }
 0x843   : > { %v1975_v31 = vadd.f32 1e-05, %v1973_v30 }
 0x844   : > { %v1972_v46 = vpop.xlane.xlu0 %1971 }
 0x845   : > { %2846 = vrsqrt.f32 %v1975_v31  ;;  %v1974_v23 = vmul.f32 0.03125, %v1972_v46  ;;  %v2196_v46 = vrot.slane %v337_v4, %v3038_v35 }
 0x847   : > { %v1976_v32 = vadd.f32 1e-05, %v1974_v23 }
 0x849   : > { %2848 = vrsqrt.f32 %v1976_v32 }
 0x84f   : > { %v2847_v36 = vpop.eup %2846 }
 0x850   : > { %v1979_v37 = vmul.f32 %v2847_v36, %v1963_v2 }
 0x852   : > { %v1985_v39 = vmul.f32 %v1984_v33, %v1979_v37 }
 0x853   : > { %v2849_v40 = vpop.eup %2848 }
 0x854   : > { %v1980_v41 = vmul.f32 %v2849_v40, %v1964_v8  ;;  %v1991_v42 = vadd.f32 %v1990_v38, %v1985_v39 }
 0x856   : > { %v1986_v43 = vmul.f32 %v1984_v33, %v1980_v41  ;;  %2653 = vmatprep.mubr.msk.f32.mxu1 %vm338_vm1, %v1991_v42 }
 0x858   : > { %v1992_v44 = vadd.f32 %v1990_v38, %v1986_v43 }
 0x85a   : > { %2654 = vmatmul.mubr.msk.f32.vlgmr.msra.gmra.mrb[22].mxu1 %vm338_vm1, %v1992_v44 }
 0x92d   : > { %v2655_v6 = vpop.f32.mrb[22].mxu1 }
 0x92e   : > { %v2079_v7 = vadd.f32 %v2655_v6, %v2000_v5  ;;  %v2073_v50 = vpop.f32.mrb[23].mxu1 }
 0x92f   : > { %v2074_v3 = vadd.f32 %v2073_v50, %v2000_v5 }
 0x930   : > { %v2085_v8 = vmul.f32 0.044715, %v2079_v7  ;;  %v2083_v29 = vmul.f32 0.5, %v2079_v7 }
 0x931   : > { %v2084_v2 = vmul.f32 0.044715, %v2074_v3  ;;  %v2082_v28 = vmul.f32 0.5, %v2074_v3 }
 0x932   : > { %v2087_v9 = vmul.f32 %v2085_v8, %v2079_v7 }
 0x933   : > { %v2086_v10 = vmul.f32 %v2084_v2, %v2074_v3 }
 0x934   : > { %v2089_v11 = vmul.f32 %v2087_v9, %v2079_v7 }
 0x935   : > { %v2088_v12 = vmul.f32 %v2086_v10, %v2074_v3 }
 0x936   : > { %v2091_v13 = vadd.f32 %v2089_v11, %v2079_v7 }
 0x937   : > { %v2090_v15 = vadd.f32 %v2088_v12, %v2074_v3 }
 0x938   : > { %v2093_v20 = vmul.f32 0.7978846, %v2091_v13 }
 0x939   : > { %v2092_v22 = vmul.f32 0.7978846, %v2090_v15 }
 0x93a   : > { %2850 = vtanh.f32 %v2093_v20 }
 0x93b   : > { %2852 = vtanh.f32 %v2092_v22 }
 0x944   : > { %v2851_v14 = vpop.eup %2850 }
 0x945   : > { %v2853_v49 = vpop.eup %2852  ;;  %v2097_v27 = vadd.f32 1.0, %v2851_v14 }
 0x946   : > { %v2096_v25 = vadd.f32 1.0, %v2853_v49 }
 0x947   : > { %v2099_v31 = vmul.f32 %v2097_v27, %v2083_v29 }
 0x948   : > { %v2098_v30 = vmul.f32 %v2096_v25, %v2082_v28 }
 0x94a   : > { %2688 = vmatprep.mubr.f32.mxu0 %v2098_v30 }
 0x94b   : > { %2689 = vmatmul.mubr.f32.vlgmr.msra.gmra.mrb[14].mxu0 %v2099_v31 }
 0x94c   : > { %2761 = vmatpush3.bf16.msra.mxu0 (!%p2458_p5), %v2758_v51 }
 0x94d   : > { %2763 = vmatprep.subr.bf16.mxu0 (!%p2458_p5), %v2762_v53 }
 0x950   : > { %2765 = vmatpush3.bf16.msra.mxu0 (!%p2458_p5), %v2762_v53 }
 0xa1e   : > { %v2690_v23 = vpop.f32.mrb[14].mxu0  ;;  %2204 = sbr.rel (%p2458_p5) target bundleno = 3127 (0xc37), region = 56 }
 0xa1f   : > { %v2192_v32 = vadd.f32 %v2690_v23, %v3188_v0  ;;  %v2182_v18 = vpop.f32.mrb[15].mxu0 }
 0xa20   : > { %v2191_v21 = vadd.f32 %v2182_v18, %v3191_v1 }
 0xa21   : > { %v2198_v33 = vadd.f32 %v2196_v46, %v2192_v32 }
 0xa22   : > { %v2197_v36 = vadd.f32 %v2196_v46, %v2191_v21 }
 0xa23   : > { %2200 = vst.msk [vmem:[#allocation2 + $0x8] sm:$0xff] %vm338_vm1, %v2198_v33  ;;  %v2209_v38 = vsel (!%p2458_p5), %vm338_vm1, %v2198_v33, 0.0 }
 0xa24   : > { %2199 = vst.msk [vmem:[#allocation2] sm:$0xff] %vm338_vm1, %v2197_v36  ;;  %v2206_v37 = vsel (!%p2458_p5), %vm338_vm1, %v2197_v36, 0.0 }
 0xa25   : > { %2207 = vadd.xlane.f32.xlu0 %v2206_v37 }
 0xa29   : > { %2210 = vadd.xlane.f32.xlu0 %v2209_v38 }
 0xab2   : > { %v2208_v39 = vpop.xlane.xlu0 %2207 }
 0xab3   : > { %v2212_v0 = vmul.f32 0.03125, %v2208_v39 }
 0xab5   : > { %v2214_v40 = vsub.f32 %v2197_v36, %v2212_v0 }
 0xab6   : > { %v2211_v41 = vpop.xlane.xlu0 %2210 }
 0xab7   : > { %v2213_v1 = vmul.f32 0.03125, %v2211_v41  ;;  %v2216_v42 = vmul.f32 %v2214_v40, %v2214_v40 }
 0xab9   : > { %v2215_v43 = vsub.f32 %v2198_v33, %v2213_v1  ;;  %v2218_v44 = vsel %vm338_vm1, %v2216_v42, 0.0 }
 0xaba   : > { %2219 = vadd.xlane.f32.xlu1 %v2218_v44 }
 0xabb   : > { %v2217_v24 = vmul.f32 %v2215_v43, %v2215_v43 }
 0xabd   : > { %v2221_v45 = vsel %vm338_vm1, %v2217_v24, 0.0 }
 0xabe   : > { %2222 = vadd.xlane.f32.xlu1 %v2221_v45 }
 0xb47   : > { %v2220_v54 = vpop.xlane.xlu1 %2219 }
 0xb48   : > { %v2224_v55 = vmul.f32 0.03125, %v2220_v54 }
 0xb4a   : > { %v2226_v56 = vadd.f32 1e-05, %v2224_v55 }
 0xb4b   : > { %v2223_v57 = vpop.xlane.xlu1 %2222 }
 0xb4c   : > { %2854 = vrsqrt.f32 %v2226_v56  ;;  %v2225_v58 = vmul.f32 0.03125, %v2223_v57 }
 0xb4e   : > { %v2227_v59 = vadd.f32 1e-05, %v2225_v58 }
 0xb50   : > { %2856 = vrsqrt.f32 %v2227_v59 }
 0xb56   : > { %v2855_v19 = vpop.eup %2854 }
 0xb57   : > { %v2230_v60 = vmul.f32 %v2855_v19, %v2214_v40 }
 0xb59   : > { %v2236_v62 = vmul.f32 %v2235_v17, %v2230_v60 }
 0xb5a   : > { %v2857_v63 = vpop.eup %2856 }
 0xb5b   : > { %v2242_v4 = vadd.f32 %v2241_v61, %v2236_v62  ;;  %v2231_v5 = vmul.f32 %v2857_v63, %v2215_v43 }
 0xb5d   : > { %2699 = vmatprep.mubr.msk.f32.mxu0 %vm338_vm1, %v2242_v4  ;;  %v2237_v6 = vmul.f32 %v2235_v17, %v2231_v5 }
 0xb5f   : > { %v2243_v7 = vadd.f32 %v2241_v61, %v2237_v6 }
 0xb61   : > { %2700 = vmatmul.mubr.msk.f32.vlgmr.msra.gmra.mrb[0].mxu0 %vm338_vm1, %v2243_v7 }
 0xc34   : > { %v2701_v50 = vpop.f32.mrb[0].mxu0 }
 0xc35   : > { %2330 = vst [vmem:[#allocation3 + $0x8] sm:$0xff] %v2701_v50  ;;  %v2320_v3 = vpop.f32.mrb[1].mxu0 }
 0xc36   : > { %2329 = vst [vmem:[#allocation3] sm:$0xff] %v2320_v3 }
 0xc37 PF: > { %p2770_p6 = scmp.eq.s32.totalorder %s2962_s25, 1  ;;  %s2914_s29 = smov [#allocation3]  }
 0xc38   : > { %s2337_s30 = sshll.u32 %s2914_s29, 4  ;;  %s2338_s30 = int_to_ptr.vmem [resolvable:$true] %s2337_s30 }
 0xc39   : > { %s2858_s8 = scalar_lea.vmem %s2338_s30, 256  ;;  %p2865_p10 = scmp.lt.s32.totalorder %s2338_s30, %s2338_s30 }
 0xc3a   : > { %p2859_p7 = scmp.ne.s32.totalorder %s2338_s30, %s2858_s8  ;;  %p2866_p11 = scmp.lt.s32.totalorder %s2858_s8, %s2858_s8 }
 0xc3c   : > { %p2860_p8 = pnand %p2859_p7, %p2770_p6  ;;  %p2867_p12 = por %p2866_p11, %p2865_p10 }
 0xc3e   : > { %p2861_p9 = pneg %p2860_p8 }
 0xc40   : > { %p2868_p13 = pnand %p2867_p12, %p2861_p9 }
 0xc42   : > { %2871 = shalt.err (!%p2868_p13)
}
 0xc43   : > { %s2872_s12 = scalar_lea.hbm %s3292_s7, 256 }
 0xc44   : > { %p2873_p0 = scmp.ne.s32.totalorder %s3292_s7, %s2872_s12  ;;  %p2878_p3 = scmp.lt.u32.totalorder %s2872_s12, %s3292_s7 }
 0xc46   : > { %p2874_p1 = pnand %p2873_p0, %p2770_p6 }
 0xc48   : > { %p2875_p2 = pneg %p2874_p1 }
 0xc4a   : > { %p2880_p4 = pnand %p2878_p3, %p2875_p2 }
 0xc4c   : > { %2883 = shalt.err (!%p2880_p4)
}
 0xc4d   : > { %s2915_s11 = smov 128  }
 0xc4e   : > { %2767 = dma.vmem_to_hbm [thread:$0]  (%p2770_p6), %s2338_s30, 256, %s3292_s7, [#allocation4], %s2915_s11, %s2915_s11, %s2911_s16  }
 0xc4f   : > { %2889 = dma.done.wait (%p2770_p6), [#allocation4], 256  }
 0xc50   : > { %2891 = vsyncadd (%p2770_p6), [#allocation4], 4294967040 }
 0xc51 PF: > { %s18_s24 = sadd.s32 1, %s2894_s24  }
 0xc52   : > { %p15_p5 = scmp.ge.s32.totalorder %s18_s24, 4  }
 0xc54   :  { %17 = sbr.rel (!%p15_p5) target bundleno = 1 (0x1), region = 92 }
 0xc5b   :  { %2353 = vsyncpa [#allocation4], 1 }
 0xc5c   :  { %2355 = vsyncpa [#allocation4 + $0x1], 1 }

</bundles_post_ra>
